<compile_context>
chip_gen: v7x
topology: tpu7x:2x2x1
jax: 0.10.0
libtpu: 0.0.40
codegen_flags: <defaults>
</compile_context>

<pallas_src>
import jax
import jax.numpy as jnp
from jax.experimental import pallas as pl
from jax.experimental.pallas import tpu as pltpu  # noqa: F401  (kept for TPU backend)

# ----------------------------- config ---------------------------------------
B = 2            # batch
T_IN = 16        # input time frames
FREQ = 16        # freq_dim
C_CONV = 4       # conv output channels
KT, KF = 5, 5    # conv kernel
ST, SF = 2, 2    # conv stride
HIDDEN = 32      # rnn_cfg['dim']
N_RNN = 2        # rnn layers
N_PRIOR = 2      # number of prior networks
N_NETS = N_PRIOR + 1      # 3 real nets
N_PAD_NETS = 4            # padded to 4 so fused hidden width is 128 lanes
OUTPUT_DIM = 10  # label classes; fc emits OUTPUT_DIM + 1 (blank)
N_CLASSES = OUTPUT_DIM + 1

T_OUT = (T_IN - KT) // ST + 1     # 6
F_OUT = (FREQ - KF) // SF + 1     # 6
D0 = C_CONV * F_OUT               # 24   per-net conv feature width
HN = N_PAD_NETS * HIDDEN          # 128  fused hidden width (net-major, padded)
GN = 3 * HN                       # 384  fused gate width ([r|z|n] gate-major)
BP = 8                            # rows per timestep, padded to one sublane tile


# ----------------------- packed-weight buffer layout -------------------------
def _layout_parts():
    parts = [('wconv', KT * FREQ, N_NETS * D0), ('bconv', 1, N_NETS * D0)]
    d_in = N_NETS * D0
    for i in range(N_RNN):
        parts += [(f'wih{i}', d_in, GN), (f'bih{i}', 1, GN),
                  (f'whh{i}', HN, GN), (f'bhh{i}', 1, GN)]
        if i < N_RNN - 1:
            parts += [(f'wcomb{i}', HN, HN), (f'bcomb{i}', 1, HN)]
            d_in = HN
        else:
            parts += [(f'wg{i}', HN, HIDDEN), (f'bg{i}', 1, HIDDEN)]
    parts += [('wfc', HIDDEN, N_CLASSES), ('bfc', 1, N_CLASSES)]
    return parts


def _build_layout():
    off, r = {}, 0
    for name, rows, cols in _layout_parts():
        off[name] = (r, rows, cols)
        r += ((rows + 7) // 8) * 8        # 8-row (sublane) aligned offsets
    return off, r


_W_OFF, _W_ROWS = _build_layout()          # (888, 384) f32 ~ 1.3 MiB
_W_COLS = GN


# --------------------------- fused Pallas kernel -----------------------------
def _fused_forward_kernel(patches_ref, w_ref, out_ref):
    def wmat(name):
        off, rows, cols = _W_OFF[name]
        return w_ref[off:off + rows, :cols]

    def wrow(name):
        off, _, cols = _W_OFF[name]
        return w_ref[off:off + 1, :cols]

    def mm(a, b):
        return jnp.dot(a, b, preferred_element_type=jnp.float32)

    # conv for all 3 nets at once; torch's transpose(1,2).view channel-major
    # flatten and the freq stride are folded into the expanded weight.
    x = jnp.maximum(mm(patches_ref[...], wmat('wconv')) + wrow('bconv'), 0.0)

    # lanes >= 64 hold the current net's gated block (+ zero pad net)
    gate_mask = (jax.lax.broadcasted_iota(jnp.int32, (1, HN), 1)
                 >= N_PRIOR * HIDDEN)

    cur = None
    for li in range(N_RNN):
        # hoisted GRU input projection: ONE matmul for all timesteps & nets
        gi_all = mm(x, wmat(f'wih{li}')) + wrow(f'bih{li}')       # (T'*BP, GN)
        whh = wmat(f'whh{li}')
        bhh = wrow(f'bhh{li}')
        # TODO(synk): hold whh in MXU staging regs across steps
        # (pltpu.matmul_push_rhs/matmul_acc_lhs); jnp.dot kept for portability.
        h = jnp.zeros((BP, HN), jnp.float32)    # [h_p0 | h_p1 | h_cur | 0]
        hs = []
        for t in range(T_OUT):                                    # static unroll
            gi = gi_all[t * BP:(t + 1) * BP, :]                   # tile-aligned
            gh = mm(h, whh) + bhh
            r = jax.nn.sigmoid(gi[:, :HN] + gh[:, :HN])
            z = jax.nn.sigmoid(gi[:, HN:2 * HN] + gh[:, HN:2 * HN])
            n = jnp.tanh(gi[:, 2 * HN:] + r * gh[:, 2 * HN:])
            h = (1.0 - z) * n + z * h
            hs.append(h)                                          # stays in vregs
        hseq = jnp.concatenate(hs, axis=0)                        # (T'*BP, HN)

        if li < N_RNN - 1:
            # gate relu((cur + sum priors) @ Wg + b): one matmul on the fused
            # hidden (Wg stacked over nets -> the sum is free); priors pass
            # through EXACTLY via the lane select; pad lanes stay zero.
            pre = mm(hseq, wmat(f'wcomb{li}')) + wrow(f'bcomb{li}')
            x = jnp.where(gate_mask, jnp.maximum(pre, 0.0), hseq)
        else:
            cur = jnp.maximum(mm(hseq, wmat(f'wg{li}')) + wrow(f'bg{li}'), 0.0)

    out_ref[...] = (mm(cur, wmat('wfc')) + wrow('bfc')).astype(out_ref.dtype)


def fused_forward(patches, wpack):
    return pl.pallas_call(
        _fused_forward_kernel,
        out_shape=jax.ShapeDtypeStruct((T_OUT * BP, N_CLASSES), jnp.float32),
    )(patches, wpack)


# ------------------------------ forward --------------------------------------
def progressive_forward(x, wpack, softmax=False):
    """x: (B, T, F) -> (B, T', OUTPUT_DIM + 1)."""
    # im2col over time only (stride-2 windows of KT frames x full FREQ); the
    # conv freq stride is folded into the fused conv weight.  Each timestep's
    # batch is padded to a full 8-row tile so the kernel is sublane-aligned.
    windows = jnp.stack([x[:, t * ST:t * ST + KT, :] for t in range(T_OUT)],
                        axis=0).reshape(T_OUT, B, KT * FREQ)
    patches = jnp.pad(windows, ((0, 0), (0, BP - B), (0, 0)))
    patches = patches.reshape(T_OUT * BP, KT * FREQ)
    out = fused_forward(patches, wpack)                       # (T'*BP, classes)
    out = out.reshape(T_OUT, BP, N_CLASSES)[:, :B, :].transpose(1, 0, 2)
    if softmax:
        out = jax.nn.softmax(out, axis=2)
    return out


# --------------------------- parameter init ----------------------------------
def init_net(key):
    keys = jax.random.split(key, 2 + 4 * N_RNN)
    params = {
        'conv_w': 0.1 * jax.random.normal(keys[0], (KT * KF, C_CONV), jnp.float32),
        'conv_b': 0.1 * jax.random.normal(keys[1], (1, C_CONV), jnp.float32),
        'rnns': [],
    }
    d = D0
    for i in range(N_RNN):
        k = keys[2 + 4 * i: 6 + 4 * i]
        params['rnns'].append({
            'wih': 0.1 * jax.random.normal(k[0], (d, 3 * HIDDEN), jnp.float32),
            'whh': 0.1 * jax.random.normal(k[1], (HIDDEN, 3 * HIDDEN), jnp.float32),
            'bih': 0.1 * jax.random.normal(k[2], (1, 3 * HIDDEN), jnp.float32),
            'bhh': 0.1 * jax.random.normal(k[3], (1, 3 * HIDDEN), jnp.float32),
        })
        d = HIDDEN
    return params


def init_progressive(key):
    keys = jax.random.split(key, N_PRIOR + 1 + N_RNN + 1)
    priors = [init_net(keys[j]) for j in range(N_PRIOR)]
    current = init_net(keys[N_PRIOR])
    gates = []
    for i in range(N_RNN):
        gk = jax.random.split(keys[N_PRIOR + 1 + i], 2)
        # graves_const init approximated by small deterministic uniform init.
        gates.append({
            'w': 0.1 * jax.random.uniform(gk[0], (HIDDEN, HIDDEN), jnp.float32,
                                          -1.0, 1.0),
            'b': 0.1 * jax.random.uniform(gk[1], (1, HIDDEN), jnp.float32,
                                          -1.0, 1.0),
        })
    fk = jax.random.split(keys[-1], 2)
    fc = {'w': 0.1 * jax.random.normal(fk[0], (HIDDEN, N_CLASSES), jnp.float32),
          'b': 0.1 * jax.random.normal(fk[1], (1, N_CLASSES), jnp.float32)}
    return {'priors': priors, 'current': current, 'gates': gates, 'fc': fc}


# --------------------- one-time fused weight preparation ----------------------
def _fuse_conv(conv_ws, conv_bs):
    """Expand per-net (KT*KF, C) conv weights into (KT*FREQ, N_NETS*C*F') so
    `time_patches @ W` directly yields torch's transpose(1,2).view(B,T',C*F')
    channel-major layout for every net (no in-kernel transpose needed)."""
    w_parts, b_parts = [], []
    for w, b in zip(conv_ws, conv_bs):
        w3 = w.reshape(KT, KF, C_CONV)
        wn = jnp.zeros((KT, FREQ, C_CONV, F_OUT), jnp.float32)
        for f in range(F_OUT):
            wn = wn.at[:, f * SF:f * SF + KF, :, f].set(w3)
        w_parts.append(wn.reshape(KT * FREQ, C_CONV * F_OUT))
        b_parts.append(jnp.repeat(b.reshape(-1), F_OUT))      # channel-major bias
    return (jnp.concatenate(w_parts, axis=1),
            jnp.concatenate(b_parts).reshape(1, -1))


def prepare_fused(params):
    """Fuse the 3 nets (block-diagonal, gate-major, padded to 4 net slots so
    HN=128) and pack EVERYTHING into one (8,128)-aligned f32 buffer -> the
    kernel sees exactly two operand DMAs (patches + this buffer)."""
    nets = params['priors'] + [params['current']]   # current net is LAST slice
    H = HIDDEN

    def fuse_w(ws, d_in, rows_total):
        out = jnp.zeros((rows_total, GN), jnp.float32)
        for j, w in enumerate(ws):
            for g in range(3):
                out = out.at[j * d_in:(j + 1) * d_in,
                             g * HN + j * H:g * HN + (j + 1) * H].set(
                                 w[:, g * H:(g + 1) * H])
        return out

    def fuse_b(bs):
        out = jnp.zeros((1, GN), jnp.float32)
        for j, b in enumerate(bs):
            for g in range(3):
                out = out.at[:, g * HN + j * H:g * HN + (j + 1) * H].set(
                    b[:, g * H:(g + 1) * H])
        return out

    tensors = {}
    tensors['wconv'], tensors['bconv'] = _fuse_conv(
        [n['conv_w'] for n in nets], [n['conv_b'] for n in nets])

    d_in, rows_in = D0, N_NETS * D0
    for i in range(N_RNN):
        rnns = [n['rnns'][i] for n in nets]
        tensors[f'wih{i}'] = fuse_w([p['wih'] for p in rnns], d_in, rows_in)
        tensors[f'bih{i}'] = fuse_b([p['bih'] for p in rnns])
        tensors[f'whh{i}'] = fuse_w([p['whh'] for p in rnns], H, HN)
        tensors[f'bhh{i}'] = fuse_b([p['bhh'] for p in rnns])

        wg, bg = params['gates'][i]['w'], params['gates'][i]['b']
        wg_stack = jnp.zeros((HN, H), jnp.float32)       # Wg stacked over nets
        for j in range(N_NETS):
            wg_stack = wg_stack.at[j * H:(j + 1) * H, :].set(wg)
        if i < N_RNN - 1:
            # full HN-wide gate output tile: only the current net's lane block
            # [64:96] is non-zero; priors pass through via the in-kernel select.
            wcomb = jnp.zeros((HN, HN), jnp.float32)
            wcomb = wcomb.at[:, N_PRIOR * H:(N_PRIOR + 1) * H].set(wg_stack)
            bcomb = jnp.zeros((1, HN), jnp.float32)
            bcomb = bcomb.at[:, N_PRIOR * H:(N_PRIOR + 1) * H].set(bg)
            tensors[f'wcomb{i}'] = wcomb
            tensors[f'bcomb{i}'] = bcomb
            d_in, rows_in = H, HN
        else:
            tensors[f'wg{i}'] = wg_stack
            tensors[f'bg{i}'] = bg

    tensors['wfc'] = params['fc']['w']
    tensors['bfc'] = params['fc']['b']

    # TODO(synk): optional bf16 cast of the matmul weights for v6e/v7x (halves
    # the weight DMA); kept f32 here for exact pass-through states and biases.
    wpack = jnp.zeros((_W_ROWS, _W_COLS), jnp.float32)
    for name, (off, rows, cols) in _W_OFF.items():
        wpack = wpack.at[off:off + rows, :cols].set(tensors[name])
    return wpack


# ---------------------- pure-JAX reference (for checking) --------------------
def reference_forward(x, params):
    def conv_net(xi, w, b):
        cols = []
        for kt in range(KT):
            for kf in range(KF):
                cols.append(xi[:, kt:kt + ST * T_OUT:ST, kf:kf + SF * F_OUT:SF])
        patches = jnp.stack(cols, axis=-1)                    # (B,T',F',KT*KF)
        y = jnp.maximum(patches @ w + b.reshape(1, 1, 1, -1), 0.0)  # (B,T',F',C)
        y = jnp.transpose(y, (0, 1, 3, 2)).reshape(B, T_OUT, C_CONV * F_OUT)
        return y

    def gru_seq(xs, p):
        hh = HIDDEN

        def step(h, x_t):
            gi = x_t @ p['wih'] + p['bih']
            gh = h @ p['whh'] + p['bhh']
            r = jax.nn.sigmoid(gi[:, :hh] + gh[:, :hh])
            z = jax.nn.sigmoid(gi[:, hh:2 * hh] + gh[:, hh:2 * hh])
            n = jnp.tanh(gi[:, 2 * hh:] + r * gh[:, 2 * hh:])
            h = (1.0 - z) * n + z * h
            return h, h

        h0 = jnp.zeros((B, hh), jnp.float32)
        _, ys = jax.lax.scan(step, h0, jnp.transpose(xs, (1, 0, 2)))
        return jnp.transpose(ys, (1, 0, 2))

    prior_h = [conv_net(x, p['conv_w'], p['conv_b']) for p in params['priors']]
    cur = conv_net(x, params['current']['conv_w'], params['current']['conv_b'])
    for i in range(N_RNN):
        hsum = 0.0
        for j in range(N_PRIOR):
            prior_h[j] = gru_seq(prior_h[j], params['priors'][j]['rnns'][i])
            hsum = hsum + prior_h[j]
        cur = gru_seq(cur, params['current']['rnns'][i])
        cur = jnp.maximum((cur + hsum) @ params['gates'][i]['w']
                          + params['gates'][i]['b'], 0.0)
    return cur @ params['fc']['w'] + params['fc']['b']


# TODO(synk): training-mode F.dropout (p>0), bidirectional RNN half-sum branch,
# and infer()/loss() (beam decode, CTCLoss, collate) are not part of the
# deterministic forward implemented here.

# ------------------------------- main ----------------------------------------
if __name__ == "__main__":
    key = jax.random.PRNGKey(0)
    kx, kp = jax.random.split(key)
    x = jax.random.normal(kx, (B, T_IN, FREQ), jnp.float32)
    params = init_progressive(kp)
    wpack = prepare_fused(params)

    fwd = jax.jit(progressive_forward)
    out = jax.block_until_ready(fwd(x, wpack))
    assert out.shape == (B, T_OUT, N_CLASSES), out.shape

    ref = jax.block_until_ready(jax.jit(reference_forward)(x, params))
    err = float(jnp.max(jnp.abs(out - ref)))
    assert err < 5e-2, f"max abs diff vs reference: {err}"
    print("KERNEL_OK")
</pallas_src>

<mosaic_0001>
module attributes {stable_mosaic.version = 11 : i64} {
  func.func @_fused_forward_kernel(%arg0: memref<48x80xf32, #tpu.memory_space<vmem>>, %arg1: memref<888x384xf32, #tpu.memory_space<vmem>>, %arg2: memref<48x11xf32, #tpu.memory_space<vmem>>) attributes {dimension_semantics = [], scalar_prefetch = 0 : i64, scratch_operands = 0 : i64, tpu.core_type = #tpu.core_type<tc>} {
    %c0 = arith.constant 0 : index
    %c0_0 = arith.constant 0 : index
    %0 = vector.load %arg0[%c0, %c0_0] : memref<48x80xf32, #tpu.memory_space<vmem>>, vector<48x80xf32>
    %c0_1 = arith.constant 0 : index
    %c0_2 = arith.constant 0 : index
    %1 = vector.load %arg1[%c0_1, %c0_2] : memref<888x384xf32, #tpu.memory_space<vmem>>, vector<80x72xf32>
    %cst = arith.constant dense<0.000000e+00> : vector<48x72xf32>
    %2 = tpu.matmul %0, %1, %cst {dimension_numbers = #tpu.dot_dimension_numbers<[1], [0], [0], [1], [0, 0, 1, 1], [], []>} : vector<48x80xf32>, vector<80x72xf32>, vector<48x72xf32> -> vector<48x72xf32>
    %c80 = arith.constant 80 : index
    %c0_3 = arith.constant 0 : index
    %3 = vector.load %arg1[%c80, %c0_3] : memref<888x384xf32, #tpu.memory_space<vmem>>, vector<1x72xf32>
    %4 = vector.broadcast %3 : vector<1x72xf32> to vector<48x72xf32>
    %5 = arith.addf %2, %4 : vector<48x72xf32>
    %cst_4 = arith.constant 0.000000e+00 : f32
    %6 = vector.broadcast %cst_4 : f32 to vector<48x72xf32>
    %7 = arith.maximumf %5, %6 : vector<48x72xf32>
    %8 = tpu.iota {dimensions = array<i32: 1>} : vector<1x128xi32>
    %c64_i32 = arith.constant 64 : i32
    %9 = vector.broadcast %c64_i32 : i32 to vector<1x128xi32>
    %10 = arith.cmpi sge, %8, %9 : vector<1x128xi32>
    %c88 = arith.constant 88 : index
    %c0_5 = arith.constant 0 : index
    %11 = vector.load %arg1[%c88, %c0_5] : memref<888x384xf32, #tpu.memory_space<vmem>>, vector<72x384xf32>
    %cst_6 = arith.constant dense<0.000000e+00> : vector<48x384xf32>
    %12 = tpu.matmul %7, %11, %cst_6 {dimension_numbers = #tpu.dot_dimension_numbers<[1], [0], [0], [1], [0, 0, 1, 1], [], []>} : vector<48x72xf32>, vector<72x384xf32>, vector<48x384xf32> -> vector<48x384xf32>
    %c160 = arith.constant 160 : index
    %c0_7 = arith.constant 0 : index
    %13 = vector.load %arg1[%c160, %c0_7] : memref<888x384xf32, #tpu.memory_space<vmem>>, vector<1x384xf32>
    %14 = vector.broadcast %13 : vector<1x384xf32> to vector<48x384xf32>
    %15 = arith.addf %12, %14 : vector<48x384xf32>
    %c168 = arith.constant 168 : index
    %c0_8 = arith.constant 0 : index
    %16 = vector.load %arg1[%c168, %c0_8] : memref<888x384xf32, #tpu.memory_space<vmem>>, vector<128x384xf32>
    %c296 = arith.constant 296 : index
    %c0_9 = arith.constant 0 : index
    %17 = vector.load %arg1[%c296, %c0_9] : memref<888x384xf32, #tpu.memory_space<vmem>>, vector<1x384xf32>
    %cst_10 = arith.constant 0.000000e+00 : f32
    %18 = vector.broadcast %cst_10 : f32 to vector<8x128xf32>
    %19 = vector.extract_strided_slice %15 {offsets = [0, 0], sizes = [8, 384], strides = [1, 1]} : vector<48x384xf32> to vector<8x384xf32>
    %cst_11 = arith.constant dense<0.000000e+00> : vector<8x384xf32>
    %20 = tpu.matmul %18, %16, %cst_11 {dimension_numbers = #tpu.dot_dimension_numbers<[1], [0], [0], [1], [0, 0, 1, 1], [], []>} : vector<8x128xf32>, vector<128x384xf32>, vector<8x384xf32> -> vector<8x384xf32>
    %21 = vector.broadcast %17 : vector<1x384xf32> to vector<8x384xf32>
    %22 = arith.addf %20, %21 : vector<8x384xf32>
    %23 = vector.extract_strided_slice %19 {offsets = [0, 0], sizes = [8, 128], strides = [1, 1]} : vector<8x384xf32> to vector<8x128xf32>
    %24 = vector.extract_strided_slice %22 {offsets = [0, 0], sizes = [8, 128], strides = [1, 1]} : vector<8x384xf32> to vector<8x128xf32>
    %25 = arith.addf %23, %24 : vector<8x128xf32>
    %26 = arith.negf %25 : vector<8x128xf32>
    %27 = math.exp %26 : vector<8x128xf32>
    %cst_12 = arith.constant 1.000000e+00 : f32
    %28 = vector.broadcast %cst_12 : f32 to vector<8x128xf32>
    %29 = arith.addf %28, %27 : vector<8x128xf32>
    %30 = arith.divf %28, %29 : vector<8x128xf32>
    %31 = vector.extract_strided_slice %19 {offsets = [0, 128], sizes = [8, 128], strides = [1, 1]} : vector<8x384xf32> to vector<8x128xf32>
    %32 = vector.extract_strided_slice %22 {offsets = [0, 128], sizes = [8, 128], strides = [1, 1]} : vector<8x384xf32> to vector<8x128xf32>
    %33 = arith.addf %31, %32 : vector<8x128xf32>
    %34 = arith.negf %33 : vector<8x128xf32>
    %35 = math.exp %34 : vector<8x128xf32>
    %cst_13 = arith.constant 1.000000e+00 : f32
    %36 = vector.broadcast %cst_13 : f32 to vector<8x128xf32>
    %37 = arith.addf %36, %35 : vector<8x128xf32>
    %38 = arith.divf %36, %37 : vector<8x128xf32>
    %39 = vector.extract_strided_slice %19 {offsets = [0, 256], sizes = [8, 128], strides = [1, 1]} : vector<8x384xf32> to vector<8x128xf32>
    %40 = vector.extract_strided_slice %22 {offsets = [0, 256], sizes = [8, 128], strides = [1, 1]} : vector<8x384xf32> to vector<8x128xf32>
    %41 = arith.mulf %30, %40 : vector<8x128xf32>
    %42 = arith.addf %39, %41 : vector<8x128xf32>
    %43 = math.tanh %42 : vector<8x128xf32>
    %cst_14 = arith.constant 1.000000e+00 : f32
    %44 = vector.broadcast %cst_14 : f32 to vector<8x128xf32>
    %45 = arith.subf %44, %38 : vector<8x128xf32>
    %46 = arith.mulf %45, %43 : vector<8x128xf32>
    %47 = arith.mulf %38, %18 : vector<8x128xf32>
    %48 = arith.addf %46, %47 : vector<8x128xf32>
    %49 = vector.extract_strided_slice %15 {offsets = [8, 0], sizes = [8, 384], strides = [1, 1]} : vector<48x384xf32> to vector<8x384xf32>
    %cst_15 = arith.constant dense<0.000000e+00> : vector<8x384xf32>
    %50 = tpu.matmul %48, %16, %cst_15 {dimension_numbers = #tpu.dot_dimension_numbers<[1], [0], [0], [1], [0, 0, 1, 1], [], []>} : vector<8x128xf32>, vector<128x384xf32>, vector<8x384xf32> -> vector<8x384xf32>
    %51 = vector.broadcast %17 : vector<1x384xf32> to vector<8x384xf32>
    %52 = arith.addf %50, %51 : vector<8x384xf32>
    %53 = vector.extract_strided_slice %49 {offsets = [0, 0], sizes = [8, 128], strides = [1, 1]} : vector<8x384xf32> to vector<8x128xf32>
    %54 = vector.extract_strided_slice %52 {offsets = [0, 0], sizes = [8, 128], strides = [1, 1]} : vector<8x384xf32> to vector<8x128xf32>
    %55 = arith.addf %53, %54 : vector<8x128xf32>
    %56 = arith.negf %55 : vector<8x128xf32>
    %57 = math.exp %56 : vector<8x128xf32>
    %cst_16 = arith.constant 1.000000e+00 : f32
    %58 = vector.broadcast %cst_16 : f32 to vector<8x128xf32>
    %59 = arith.addf %58, %57 : vector<8x128xf32>
    %60 = arith.divf %58, %59 : vector<8x128xf32>
    %61 = vector.extract_strided_slice %49 {offsets = [0, 128], sizes = [8, 128], strides = [1, 1]} : vector<8x384xf32> to vector<8x128xf32>
    %62 = vector.extract_strided_slice %52 {offsets = [0, 128], sizes = [8, 128], strides = [1, 1]} : vector<8x384xf32> to vector<8x128xf32>
    %63 = arith.addf %61, %62 : vector<8x128xf32>
    %64 = arith.negf %63 : vector<8x128xf32>
    %65 = math.exp %64 : vector<8x128xf32>
    %cst_17 = arith.constant 1.000000e+00 : f32
    %66 = vector.broadcast %cst_17 : f32 to vector<8x128xf32>
    %67 = arith.addf %66, %65 : vector<8x128xf32>
    %68 = arith.divf %66, %67 : vector<8x128xf32>
    %69 = vector.extract_strided_slice %49 {offsets = [0, 256], sizes = [8, 128], strides = [1, 1]} : vector<8x384xf32> to vector<8x128xf32>
    %70 = vector.extract_strided_slice %52 {offsets = [0, 256], sizes = [8, 128], strides = [1, 1]} : vector<8x384xf32> to vector<8x128xf32>
    %71 = arith.mulf %60, %70 : vector<8x128xf32>
    %72 = arith.addf %69, %71 : vector<8x128xf32>
    %73 = math.tanh %72 : vector<8x128xf32>
    %cst_18 = arith.constant 1.000000e+00 : f32
    %74 = vector.broadcast %cst_18 : f32 to vector<8x128xf32>
    %75 = arith.subf %74, %68 : vector<8x128xf32>
    %76 = arith.mulf %75, %73 : vector<8x128xf32>
    %77 = arith.mulf %68, %48 : vector<8x128xf32>
    %78 = arith.addf %76, %77 : vector<8x128xf32>
    %79 = vector.extract_strided_slice %15 {offsets = [16, 0], sizes = [8, 384], strides = [1, 1]} : vector<48x384xf32> to vector<8x384xf32>
    %cst_19 = arith.constant dense<0.000000e+00> : vector<8x384xf32>
    %80 = tpu.matmul %78, %16, %cst_19 {dimension_numbers = #tpu.dot_dimension_numbers<[1], [0], [0], [1], [0, 0, 1, 1], [], []>} : vector<8x128xf32>, vector<128x384xf32>, vector<8x384xf32> -> vector<8x384xf32>
    %81 = vector.broadcast %17 : vector<1x384xf32> to vector<8x384xf32>
    %82 = arith.addf %80, %81 : vector<8x384xf32>
    %83 = vector.extract_strided_slice %79 {offsets = [0, 0], sizes = [8, 128], strides = [1, 1]} : vector<8x384xf32> to vector<8x128xf32>
    %84 = vector.extract_strided_slice %82 {offsets = [0, 0], sizes = [8, 128], strides = [1, 1]} : vector<8x384xf32> to vector<8x128xf32>
    %85 = arith.addf %83, %84 : vector<8x128xf32>
    %86 = arith.negf %85 : vector<8x128xf32>
    %87 = math.exp %86 : vector<8x128xf32>
    %cst_20 = arith.constant 1.000000e+00 : f32
    %88 = vector.broadcast %cst_20 : f32 to vector<8x128xf32>
    %89 = arith.addf %88, %87 : vector<8x128xf32>
    %90 = arith.divf %88, %89 : vector<8x128xf32>
    %91 = vector.extract_strided_slice %79 {offsets = [0, 128], sizes = [8, 128], strides = [1, 1]} : vector<8x384xf32> to vector<8x128xf32>
    %92 = vector.extract_strided_slice %82 {offsets = [0, 128], sizes = [8, 128], strides = [1, 1]} : vector<8x384xf32> to vector<8x128xf32>
    %93 = arith.addf %91, %92 : vector<8x128xf32>
    %94 = arith.negf %93 : vector<8x128xf32>
    %95 = math.exp %94 : vector<8x128xf32>
    %cst_21 = arith.constant 1.000000e+00 : f32
    %96 = vector.broadcast %cst_21 : f32 to vector<8x128xf32>
    %97 = arith.addf %96, %95 : vector<8x128xf32>
    %98 = arith.divf %96, %97 : vector<8x128xf32>
    %99 = vector.extract_strided_slice %79 {offsets = [0, 256], sizes = [8, 128], strides = [1, 1]} : vector<8x384xf32> to vector<8x128xf32>
    %100 = vector.extract_strided_slice %82 {offsets = [0, 256], sizes = [8, 128], strides = [1, 1]} : vector<8x384xf32> to vector<8x128xf32>
    %101 = arith.mulf %90, %100 : vector<8x128xf32>
    %102 = arith.addf %99, %101 : vector<8x128xf32>
    %103 = math.tanh %102 : vector<8x128xf32>
    %cst_22 = arith.constant 1.000000e+00 : f32
    %104 = vector.broadcast %cst_22 : f32 to vector<8x128xf32>
    %105 = arith.subf %104, %98 : vector<8x128xf32>
    %106 = arith.mulf %105, %103 : vector<8x128xf32>
    %107 = arith.mulf %98, %78 : vector<8x128xf32>
    %108 = arith.addf %106, %107 : vector<8x128xf32>
    %109 = vector.extract_strided_slice %15 {offsets = [24, 0], sizes = [8, 384], strides = [1, 1]} : vector<48x384xf32> to vector<8x384xf32>
    %cst_23 = arith.constant dense<0.000000e+00> : vector<8x384xf32>
    %110 = tpu.matmul %108, %16, %cst_23 {dimension_numbers = #tpu.dot_dimension_numbers<[1], [0], [0], [1], [0, 0, 1, 1], [], []>} : vector<8x128xf32>, vector<128x384xf32>, vector<8x384xf32> -> vector<8x384xf32>
    %111 = vector.broadcast %17 : vector<1x384xf32> to vector<8x384xf32>
    %112 = arith.addf %110, %111 : vector<8x384xf32>
    %113 = vector.extract_strided_slice %109 {offsets = [0, 0], sizes = [8, 128], strides = [1, 1]} : vector<8x384xf32> to vector<8x128xf32>
    %114 = vector.extract_strided_slice %112 {offsets = [0, 0], sizes = [8, 128], strides = [1, 1]} : vector<8x384xf32> to vector<8x128xf32>
    %115 = arith.addf %113, %114 : vector<8x128xf32>
    %116 = arith.negf %115 : vector<8x128xf32>
    %117 = math.exp %116 : vector<8x128xf32>
    %cst_24 = arith.constant 1.000000e+00 : f32
    %118 = vector.broadcast %cst_24 : f32 to vector<8x128xf32>
    %119 = arith.addf %118, %117 : vector<8x128xf32>
    %120 = arith.divf %118, %119 : vector<8x128xf32>
    %121 = vector.extract_strided_slice %109 {offsets = [0, 128], sizes = [8, 128], strides = [1, 1]} : vector<8x384xf32> to vector<8x128xf32>
    %122 = vector.extract_strided_slice %112 {offsets = [0, 128], sizes = [8, 128], strides = [1, 1]} : vector<8x384xf32> to vector<8x128xf32>
    %123 = arith.addf %121, %122 : vector<8x128xf32>
    %124 = arith.negf %123 : vector<8x128xf32>
    %125 = math.exp %124 : vector<8x128xf32>
    %cst_25 = arith.constant 1.000000e+00 : f32
    %126 = vector.broadcast %cst_25 : f32 to vector<8x128xf32>
    %127 = arith.addf %126, %125 : vector<8x128xf32>
    %128 = arith.divf %126, %127 : vector<8x128xf32>
    %129 = vector.extract_strided_slice %109 {offsets = [0, 256], sizes = [8, 128], strides = [1, 1]} : vector<8x384xf32> to vector<8x128xf32>
    %130 = vector.extract_strided_slice %112 {offsets = [0, 256], sizes = [8, 128], strides = [1, 1]} : vector<8x384xf32> to vector<8x128xf32>
    %131 = arith.mulf %120, %130 : vector<8x128xf32>
    %132 = arith.addf %129, %131 : vector<8x128xf32>
    %133 = math.tanh %132 : vector<8x128xf32>
    %cst_26 = arith.constant 1.000000e+00 : f32
    %134 = vector.broadcast %cst_26 : f32 to vector<8x128xf32>
    %135 = arith.subf %134, %128 : vector<8x128xf32>
    %136 = arith.mulf %135, %133 : vector<8x128xf32>
    %137 = arith.mulf %128, %108 : vector<8x128xf32>
    %138 = arith.addf %136, %137 : vector<8x128xf32>
    %139 = vector.extract_strided_slice %15 {offsets = [32, 0], sizes = [8, 384], strides = [1, 1]} : vector<48x384xf32> to vector<8x384xf32>
    %cst_27 = arith.constant dense<0.000000e+00> : vector<8x384xf32>
    %140 = tpu.matmul %138, %16, %cst_27 {dimension_numbers = #tpu.dot_dimension_numbers<[1], [0], [0], [1], [0, 0, 1, 1], [], []>} : vector<8x128xf32>, vector<128x384xf32>, vector<8x384xf32> -> vector<8x384xf32>
    %141 = vector.broadcast %17 : vector<1x384xf32> to vector<8x384xf32>
    %142 = arith.addf %140, %141 : vector<8x384xf32>
    %143 = vector.extract_strided_slice %139 {offsets = [0, 0], sizes = [8, 128], strides = [1, 1]} : vector<8x384xf32> to vector<8x128xf32>
    %144 = vector.extract_strided_slice %142 {offsets = [0, 0], sizes = [8, 128], strides = [1, 1]} : vector<8x384xf32> to vector<8x128xf32>
    %145 = arith.addf %143, %144 : vector<8x128xf32>
    %146 = arith.negf %145 : vector<8x128xf32>
    %147 = math.exp %146 : vector<8x128xf32>
    %cst_28 = arith.constant 1.000000e+00 : f32
    %148 = vector.broadcast %cst_28 : f32 to vector<8x128xf32>
    %149 = arith.addf %148, %147 : vector<8x128xf32>
    %150 = arith.divf %148, %149 : vector<8x128xf32>
    %151 = vector.extract_strided_slice %139 {offsets = [0, 128], sizes = [8, 128], strides = [1, 1]} : vector<8x384xf32> to vector<8x128xf32>
    %152 = vector.extract_strided_slice %142 {offsets = [0, 128], sizes = [8, 128], strides = [1, 1]} : vector<8x384xf32> to vector<8x128xf32>
    %153 = arith.addf %151, %152 : vector<8x128xf32>
    %154 = arith.negf %153 : vector<8x128xf32>
    %155 = math.exp %154 : vector<8x128xf32>
    %cst_29 = arith.constant 1.000000e+00 : f32
    %156 = vector.broadcast %cst_29 : f32 to vector<8x128xf32>
    %157 = arith.addf %156, %155 : vector<8x128xf32>
    %158 = arith.divf %156, %157 : vector<8x128xf32>
    %159 = vector.extract_strided_slice %139 {offsets = [0, 256], sizes = [8, 128], strides = [1, 1]} : vector<8x384xf32> to vector<8x128xf32>
    %160 = vector.extract_strided_slice %142 {offsets = [0, 256], sizes = [8, 128], strides = [1, 1]} : vector<8x384xf32> to vector<8x128xf32>
    %161 = arith.mulf %150, %160 : vector<8x128xf32>
    %162 = arith.addf %159, %161 : vector<8x128xf32>
    %163 = math.tanh %162 : vector<8x128xf32>
    %cst_30 = arith.constant 1.000000e+00 : f32
    %164 = vector.broadcast %cst_30 : f32 to vector<8x128xf32>
    %165 = arith.subf %164, %158 : vector<8x128xf32>
    %166 = arith.mulf %165, %163 : vector<8x128xf32>
    %167 = arith.mulf %158, %138 : vector<8x128xf32>
    %168 = arith.addf %166, %167 : vector<8x128xf32>
    %169 = vector.extract_strided_slice %15 {offsets = [40, 0], sizes = [8, 384], strides = [1, 1]} : vector<48x384xf32> to vector<8x384xf32>
    %cst_31 = arith.constant dense<0.000000e+00> : vector<8x384xf32>
    %170 = tpu.matmul %168, %16, %cst_31 {dimension_numbers = #tpu.dot_dimension_numbers<[1], [0], [0], [1], [0, 0, 1, 1], [], []>} : vector<8x128xf32>, vector<128x384xf32>, vector<8x384xf32> -> vector<8x384xf32>
    %171 = vector.broadcast %17 : vector<1x384xf32> to vector<8x384xf32>
    %172 = arith.addf %170, %171 : vector<8x384xf32>
    %173 = vector.extract_strided_slice %169 {offsets = [0, 0], sizes = [8, 128], strides = [1, 1]} : vector<8x384xf32> to vector<8x128xf32>
    %174 = vector.extract_strided_slice %172 {offsets = [0, 0], sizes = [8, 128], strides = [1, 1]} : vector<8x384xf32> to vector<8x128xf32>
    %175 = arith.addf %173, %174 : vector<8x128xf32>
    %176 = arith.negf %175 : vector<8x128xf32>
    %177 = math.exp %176 : vector<8x128xf32>
    %cst_32 = arith.constant 1.000000e+00 : f32
    %178 = vector.broadcast %cst_32 : f32 to vector<8x128xf32>
    %179 = arith.addf %178, %177 : vector<8x128xf32>
    %180 = arith.divf %178, %179 : vector<8x128xf32>
    %181 = vector.extract_strided_slice %169 {offsets = [0, 128], sizes = [8, 128], strides = [1, 1]} : vector<8x384xf32> to vector<8x128xf32>
    %182 = vector.extract_strided_slice %172 {offsets = [0, 128], sizes = [8, 128], strides = [1, 1]} : vector<8x384xf32> to vector<8x128xf32>
    %183 = arith.addf %181, %182 : vector<8x128xf32>
    %184 = arith.negf %183 : vector<8x128xf32>
    %185 = math.exp %184 : vector<8x128xf32>
    %cst_33 = arith.constant 1.000000e+00 : f32
    %186 = vector.broadcast %cst_33 : f32 to vector<8x128xf32>
    %187 = arith.addf %186, %185 : vector<8x128xf32>
    %188 = arith.divf %186, %187 : vector<8x128xf32>
    %189 = vector.extract_strided_slice %169 {offsets = [0, 256], sizes = [8, 128], strides = [1, 1]} : vector<8x384xf32> to vector<8x128xf32>
    %190 = vector.extract_strided_slice %172 {offsets = [0, 256], sizes = [8, 128], strides = [1, 1]} : vector<8x384xf32> to vector<8x128xf32>
    %191 = arith.mulf %180, %190 : vector<8x128xf32>
    %192 = arith.addf %189, %191 : vector<8x128xf32>
    %193 = math.tanh %192 : vector<8x128xf32>
    %cst_34 = arith.constant 1.000000e+00 : f32
    %194 = vector.broadcast %cst_34 : f32 to vector<8x128xf32>
    %195 = arith.subf %194, %188 : vector<8x128xf32>
    %196 = arith.mulf %195, %193 : vector<8x128xf32>
    %197 = arith.mulf %188, %168 : vector<8x128xf32>
    %198 = arith.addf %196, %197 : vector<8x128xf32>
    %199 = tpu.concatenate %48, %78, %108, %138, %168, %198 in 0 : vector<8x128xf32>, vector<8x128xf32>, vector<8x128xf32>, vector<8x128xf32>, vector<8x128xf32>, vector<8x128xf32> -> vector<48x128xf32>
    %c304 = arith.constant 304 : index
    %c0_35 = arith.constant 0 : index
    %200 = vector.load %arg1[%c304, %c0_35] : memref<888x384xf32, #tpu.memory_space<vmem>>, vector<128x128xf32>
    %cst_36 = arith.constant dense<0.000000e+00> : vector<48x128xf32>
    %201 = tpu.matmul %199, %200, %cst_36 {dimension_numbers = #tpu.dot_dimension_numbers<[1], [0], [0], [1], [0, 0, 1, 1], [], []>} : vector<48x128xf32>, vector<128x128xf32>, vector<48x128xf32> -> vector<48x128xf32>
    %c432 = arith.constant 432 : index
    %c0_37 = arith.constant 0 : index
    %202 = vector.load %arg1[%c432, %c0_37] : memref<888x384xf32, #tpu.memory_space<vmem>>, vector<1x128xf32>
    %203 = vector.broadcast %202 : vector<1x128xf32> to vector<48x128xf32>
    %204 = arith.addf %201, %203 : vector<48x128xf32>
    %cst_38 = arith.constant 0.000000e+00 : f32
    %205 = vector.broadcast %cst_38 : f32 to vector<48x128xf32>
    %206 = arith.maximumf %204, %205 : vector<48x128xf32>
    %207 = vector.shape_cast %10 : vector<1x128xi1> to vector<1x128xi1>
    %208 = vector.broadcast %207 : vector<1x128xi1> to vector<48x128xi1>
    %209 = arith.select %208, %206, %199 : vector<48x128xi1>, vector<48x128xf32>
    %c440 = arith.constant 440 : index
    %c0_39 = arith.constant 0 : index
    %210 = vector.load %arg1[%c440, %c0_39] : memref<888x384xf32, #tpu.memory_space<vmem>>, vector<128x384xf32>
    %cst_40 = arith.constant dense<0.000000e+00> : vector<48x384xf32>
    %211 = tpu.matmul %209, %210, %cst_40 {dimension_numbers = #tpu.dot_dimension_numbers<[1], [0], [0], [1], [0, 0, 1, 1], [], []>} : vector<48x128xf32>, vector<128x384xf32>, vector<48x384xf32> -> vector<48x384xf32>
    %c568 = arith.constant 568 : index
    %c0_41 = arith.constant 0 : index
    %212 = vector.load %arg1[%c568, %c0_41] : memref<888x384xf32, #tpu.memory_space<vmem>>, vector<1x384xf32>
    %213 = vector.broadcast %212 : vector<1x384xf32> to vector<48x384xf32>
    %214 = arith.addf %211, %213 : vector<48x384xf32>
    %c576 = arith.constant 576 : index
    %c0_42 = arith.constant 0 : index
    %215 = vector.load %arg1[%c576, %c0_42] : memref<888x384xf32, #tpu.memory_space<vmem>>, vector<128x384xf32>
    %c704 = arith.constant 704 : index
    %c0_43 = arith.constant 0 : index
    %216 = vector.load %arg1[%c704, %c0_43] : memref<888x384xf32, #tpu.memory_space<vmem>>, vector<1x384xf32>
    %cst_44 = arith.constant 0.000000e+00 : f32
    %217 = vector.broadcast %cst_44 : f32 to vector<8x128xf32>
    %218 = vector.extract_strided_slice %214 {offsets = [0, 0], sizes = [8, 384], strides = [1, 1]} : vector<48x384xf32> to vector<8x384xf32>
    %cst_45 = arith.constant dense<0.000000e+00> : vector<8x384xf32>
    %219 = tpu.matmul %217, %215, %cst_45 {dimension_numbers = #tpu.dot_dimension_numbers<[1], [0], [0], [1], [0, 0, 1, 1], [], []>} : vector<8x128xf32>, vector<128x384xf32>, vector<8x384xf32> -> vector<8x384xf32>
    %220 = vector.broadcast %216 : vector<1x384xf32> to vector<8x384xf32>
    %221 = arith.addf %219, %220 : vector<8x384xf32>
    %222 = vector.extract_strided_slice %218 {offsets = [0, 0], sizes = [8, 128], strides = [1, 1]} : vector<8x384xf32> to vector<8x128xf32>
    %223 = vector.extract_strided_slice %221 {offsets = [0, 0], sizes = [8, 128], strides = [1, 1]} : vector<8x384xf32> to vector<8x128xf32>
    %224 = arith.addf %222, %223 : vector<8x128xf32>
    %225 = arith.negf %224 : vector<8x128xf32>
    %226 = math.exp %225 : vector<8x128xf32>
    %cst_46 = arith.constant 1.000000e+00 : f32
    %227 = vector.broadcast %cst_46 : f32 to vector<8x128xf32>
    %228 = arith.addf %227, %226 : vector<8x128xf32>
    %229 = arith.divf %227, %228 : vector<8x128xf32>
    %230 = vector.extract_strided_slice %218 {offsets = [0, 128], sizes = [8, 128], strides = [1, 1]} : vector<8x384xf32> to vector<8x128xf32>
    %231 = vector.extract_strided_slice %221 {offsets = [0, 128], sizes = [8, 128], strides = [1, 1]} : vector<8x384xf32> to vector<8x128xf32>
    %232 = arith.addf %230, %231 : vector<8x128xf32>
    %233 = arith.negf %232 : vector<8x128xf32>
    %234 = math.exp %233 : vector<8x128xf32>
    %cst_47 = arith.constant 1.000000e+00 : f32
    %235 = vector.broadcast %cst_47 : f32 to vector<8x128xf32>
    %236 = arith.addf %235, %234 : vector<8x128xf32>
    %237 = arith.divf %235, %236 : vector<8x128xf32>
    %238 = vector.extract_strided_slice %218 {offsets = [0, 256], sizes = [8, 128], strides = [1, 1]} : vector<8x384xf32> to vector<8x128xf32>
    %239 = vector.extract_strided_slice %221 {offsets = [0, 256], sizes = [8, 128], strides = [1, 1]} : vector<8x384xf32> to vector<8x128xf32>
    %240 = arith.mulf %229, %239 : vector<8x128xf32>
    %241 = arith.addf %238, %240 : vector<8x128xf32>
    %242 = math.tanh %241 : vector<8x128xf32>
    %cst_48 = arith.constant 1.000000e+00 : f32
    %243 = vector.broadcast %cst_48 : f32 to vector<8x128xf32>
    %244 = arith.subf %243, %237 : vector<8x128xf32>
    %245 = arith.mulf %244, %242 : vector<8x128xf32>
    %246 = arith.mulf %237, %217 : vector<8x128xf32>
    %247 = arith.addf %245, %246 : vector<8x128xf32>
    %248 = vector.extract_strided_slice %214 {offsets = [8, 0], sizes = [8, 384], strides = [1, 1]} : vector<48x384xf32> to vector<8x384xf32>
    %cst_49 = arith.constant dense<0.000000e+00> : vector<8x384xf32>
    %249 = tpu.matmul %247, %215, %cst_49 {dimension_numbers = #tpu.dot_dimension_numbers<[1], [0], [0], [1], [0, 0, 1, 1], [], []>} : vector<8x128xf32>, vector<128x384xf32>, vector<8x384xf32> -> vector<8x384xf32>
    %250 = vector.broadcast %216 : vector<1x384xf32> to vector<8x384xf32>
    %251 = arith.addf %249, %250 : vector<8x384xf32>
    %252 = vector.extract_strided_slice %248 {offsets = [0, 0], sizes = [8, 128], strides = [1, 1]} : vector<8x384xf32> to vector<8x128xf32>
    %253 = vector.extract_strided_slice %251 {offsets = [0, 0], sizes = [8, 128], strides = [1, 1]} : vector<8x384xf32> to vector<8x128xf32>
    %254 = arith.addf %252, %253 : vector<8x128xf32>
    %255 = arith.negf %254 : vector<8x128xf32>
    %256 = math.exp %255 : vector<8x128xf32>
    %cst_50 = arith.constant 1.000000e+00 : f32
    %257 = vector.broadcast %cst_50 : f32 to vector<8x128xf32>
    %258 = arith.addf %257, %256 : vector<8x128xf32>
    %259 = arith.divf %257, %258 : vector<8x128xf32>
    %260 = vector.extract_strided_slice %248 {offsets = [0, 128], sizes = [8, 128], strides = [1, 1]} : vector<8x384xf32> to vector<8x128xf32>
    %261 = vector.extract_strided_slice %251 {offsets = [0, 128], sizes = [8, 128], strides = [1, 1]} : vector<8x384xf32> to vector<8x128xf32>
    %262 = arith.addf %260, %261 : vector<8x128xf32>
    %263 = arith.negf %262 : vector<8x128xf32>
    %264 = math.exp %263 : vector<8x128xf32>
    %cst_51 = arith.constant 1.000000e+00 : f32
    %265 = vector.broadcast %cst_51 : f32 to vector<8x128xf32>
    %266 = arith.addf %265, %264 : vector<8x128xf32>
    %267 = arith.divf %265, %266 : vector<8x128xf32>
    %268 = vector.extract_strided_slice %248 {offsets = [0, 256], sizes = [8, 128], strides = [1, 1]} : vector<8x384xf32> to vector<8x128xf32>
    %269 = vector.extract_strided_slice %251 {offsets = [0, 256], sizes = [8, 128], strides = [1, 1]} : vector<8x384xf32> to vector<8x128xf32>
    %270 = arith.mulf %259, %269 : vector<8x128xf32>
    %271 = arith.addf %268, %270 : vector<8x128xf32>
    %272 = math.tanh %271 : vector<8x128xf32>
    %cst_52 = arith.constant 1.000000e+00 : f32
    %273 = vector.broadcast %cst_52 : f32 to vector<8x128xf32>
    %274 = arith.subf %273, %267 : vector<8x128xf32>
    %275 = arith.mulf %274, %272 : vector<8x128xf32>
    %276 = arith.mulf %267, %247 : vector<8x128xf32>
    %277 = arith.addf %275, %276 : vector<8x128xf32>
    %278 = vector.extract_strided_slice %214 {offsets = [16, 0], sizes = [8, 384], strides = [1, 1]} : vector<48x384xf32> to vector<8x384xf32>
    %cst_53 = arith.constant dense<0.000000e+00> : vector<8x384xf32>
    %279 = tpu.matmul %277, %215, %cst_53 {dimension_numbers = #tpu.dot_dimension_numbers<[1], [0], [0], [1], [0, 0, 1, 1], [], []>} : vector<8x128xf32>, vector<128x384xf32>, vector<8x384xf32> -> vector<8x384xf32>
    %280 = vector.broadcast %216 : vector<1x384xf32> to vector<8x384xf32>
    %281 = arith.addf %279, %280 : vector<8x384xf32>
    %282 = vector.extract_strided_slice %278 {offsets = [0, 0], sizes = [8, 128], strides = [1, 1]} : vector<8x384xf32> to vector<8x128xf32>
    %283 = vector.extract_strided_slice %281 {offsets = [0, 0], sizes = [8, 128], strides = [1, 1]} : vector<8x384xf32> to vector<8x128xf32>
    %284 = arith.addf %282, %283 : vector<8x128xf32>
    %285 = arith.negf %284 : vector<8x128xf32>
    %286 = math.exp %285 : vector<8x128xf32>
    %cst_54 = arith.constant 1.000000e+00 : f32
    %287 = vector.broadcast %cst_54 : f32 to vector<8x128xf32>
    %288 = arith.addf %287, %286 : vector<8x128xf32>
    %289 = arith.divf %287, %288 : vector<8x128xf32>
    %290 = vector.extract_strided_slice %278 {offsets = [0, 128], sizes = [8, 128], strides = [1, 1]} : vector<8x384xf32> to vector<8x128xf32>
    %291 = vector.extract_strided_slice %281 {offsets = [0, 128], sizes = [8, 128], strides = [1, 1]} : vector<8x384xf32> to vector<8x128xf32>
    %292 = arith.addf %290, %291 : vector<8x128xf32>
    %293 = arith.negf %292 : vector<8x128xf32>
    %294 = math.exp %293 : vector<8x128xf32>
    %cst_55 = arith.constant 1.000000e+00 : f32
    %295 = vector.broadcast %cst_55 : f32 to vector<8x128xf32>
    %296 = arith.addf %295, %294 : vector<8x128xf32>
    %297 = arith.divf %295, %296 : vector<8x128xf32>
    %298 = vector.extract_strided_slice %278 {offsets = [0, 256], sizes = [8, 128], strides = [1, 1]} : vector<8x384xf32> to vector<8x128xf32>
    %299 = vector.extract_strided_slice %281 {offsets = [0, 256], sizes = [8, 128], strides = [1, 1]} : vector<8x384xf32> to vector<8x128xf32>
    %300 = arith.mulf %289, %299 : vector<8x128xf32>
    %301 = arith.addf %298, %300 : vector<8x128xf32>
    %302 = math.tanh %301 : vector<8x128xf32>
    %cst_56 = arith.constant 1.000000e+00 : f32
    %303 = vector.broadcast %cst_56 : f32 to vector<8x128xf32>
    %304 = arith.subf %303, %297 : vector<8x128xf32>
    %305 = arith.mulf %304, %302 : vector<8x128xf32>
    %306 = arith.mulf %297, %277 : vector<8x128xf32>
    %307 = arith.addf %305, %306 : vector<8x128xf32>
    %308 = vector.extract_strided_slice %214 {offsets = [24, 0], sizes = [8, 384], strides = [1, 1]} : vector<48x384xf32> to vector<8x384xf32>
    %cst_57 = arith.constant dense<0.000000e+00> : vector<8x384xf32>
    %309 = tpu.matmul %307, %215, %cst_57 {dimension_numbers = #tpu.dot_dimension_numbers<[1], [0], [0], [1], [0, 0, 1, 1], [], []>} : vector<8x128xf32>, vector<128x384xf32>, vector<8x384xf32> -> vector<8x384xf32>
    %310 = vector.broadcast %216 : vector<1x384xf32> to vector<8x384xf32>
    %311 = arith.addf %309, %310 : vector<8x384xf32>
    %312 = vector.extract_strided_slice %308 {offsets = [0, 0], sizes = [8, 128], strides = [1, 1]} : vector<8x384xf32> to vector<8x128xf32>
    %313 = vector.extract_strided_slice %311 {offsets = [0, 0], sizes = [8, 128], strides = [1, 1]} : vector<8x384xf32> to vector<8x128xf32>
    %314 = arith.addf %312, %313 : vector<8x128xf32>
    %315 = arith.negf %314 : vector<8x128xf32>
    %316 = math.exp %315 : vector<8x128xf32>
    %cst_58 = arith.constant 1.000000e+00 : f32
    %317 = vector.broadcast %cst_58 : f32 to vector<8x128xf32>
    %318 = arith.addf %317, %316 : vector<8x128xf32>
    %319 = arith.divf %317, %318 : vector<8x128xf32>
    %320 = vector.extract_strided_slice %308 {offsets = [0, 128], sizes = [8, 128], strides = [1, 1]} : vector<8x384xf32> to vector<8x128xf32>
    %321 = vector.extract_strided_slice %311 {offsets = [0, 128], sizes = [8, 128], strides = [1, 1]} : vector<8x384xf32> to vector<8x128xf32>
    %322 = arith.addf %320, %321 : vector<8x128xf32>
    %323 = arith.negf %322 : vector<8x128xf32>
    %324 = math.exp %323 : vector<8x128xf32>
    %cst_59 = arith.constant 1.000000e+00 : f32
    %325 = vector.broadcast %cst_59 : f32 to vector<8x128xf32>
    %326 = arith.addf %325, %324 : vector<8x128xf32>
    %327 = arith.divf %325, %326 : vector<8x128xf32>
    %328 = vector.extract_strided_slice %308 {offsets = [0, 256], sizes = [8, 128], strides = [1, 1]} : vector<8x384xf32> to vector<8x128xf32>
    %329 = vector.extract_strided_slice %311 {offsets = [0, 256], sizes = [8, 128], strides = [1, 1]} : vector<8x384xf32> to vector<8x128xf32>
    %330 = arith.mulf %319, %329 : vector<8x128xf32>
    %331 = arith.addf %328, %330 : vector<8x128xf32>
    %332 = math.tanh %331 : vector<8x128xf32>
    %cst_60 = arith.constant 1.000000e+00 : f32
    %333 = vector.broadcast %cst_60 : f32 to vector<8x128xf32>
    %334 = arith.subf %333, %327 : vector<8x128xf32>
    %335 = arith.mulf %334, %332 : vector<8x128xf32>
    %336 = arith.mulf %327, %307 : vector<8x128xf32>
    %337 = arith.addf %335, %336 : vector<8x128xf32>
    %338 = vector.extract_strided_slice %214 {offsets = [32, 0], sizes = [8, 384], strides = [1, 1]} : vector<48x384xf32> to vector<8x384xf32>
    %cst_61 = arith.constant dense<0.000000e+00> : vector<8x384xf32>
    %339 = tpu.matmul %337, %215, %cst_61 {dimension_numbers = #tpu.dot_dimension_numbers<[1], [0], [0], [1], [0, 0, 1, 1], [], []>} : vector<8x128xf32>, vector<128x384xf32>, vector<8x384xf32> -> vector<8x384xf32>
    %340 = vector.broadcast %216 : vector<1x384xf32> to vector<8x384xf32>
    %341 = arith.addf %339, %340 : vector<8x384xf32>
    %342 = vector.extract_strided_slice %338 {offsets = [0, 0], sizes = [8, 128], strides = [1, 1]} : vector<8x384xf32> to vector<8x128xf32>
    %343 = vector.extract_strided_slice %341 {offsets = [0, 0], sizes = [8, 128], strides = [1, 1]} : vector<8x384xf32> to vector<8x128xf32>
    %344 = arith.addf %342, %343 : vector<8x128xf32>
    %345 = arith.negf %344 : vector<8x128xf32>
    %346 = math.exp %345 : vector<8x128xf32>
    %cst_62 = arith.constant 1.000000e+00 : f32
    %347 = vector.broadcast %cst_62 : f32 to vector<8x128xf32>
    %348 = arith.addf %347, %346 : vector<8x128xf32>
    %349 = arith.divf %347, %348 : vector<8x128xf32>
    %350 = vector.extract_strided_slice %338 {offsets = [0, 128], sizes = [8, 128], strides = [1, 1]} : vector<8x384xf32> to vector<8x128xf32>
    %351 = vector.extract_strided_slice %341 {offsets = [0, 128], sizes = [8, 128], strides = [1, 1]} : vector<8x384xf32> to vector<8x128xf32>
    %352 = arith.addf %350, %351 : vector<8x128xf32>
    %353 = arith.negf %352 : vector<8x128xf32>
    %354 = math.exp %353 : vector<8x128xf32>
    %cst_63 = arith.constant 1.000000e+00 : f32
    %355 = vector.broadcast %cst_63 : f32 to vector<8x128xf32>
    %356 = arith.addf %355, %354 : vector<8x128xf32>
    %357 = arith.divf %355, %356 : vector<8x128xf32>
    %358 = vector.extract_strided_slice %338 {offsets = [0, 256], sizes = [8, 128], strides = [1, 1]} : vector<8x384xf32> to vector<8x128xf32>
    %359 = vector.extract_strided_slice %341 {offsets = [0, 256], sizes = [8, 128], strides = [1, 1]} : vector<8x384xf32> to vector<8x128xf32>
    %360 = arith.mulf %349, %359 : vector<8x128xf32>
    %361 = arith.addf %358, %360 : vector<8x128xf32>
    %362 = math.tanh %361 : vector<8x128xf32>
    %cst_64 = arith.constant 1.000000e+00 : f32
    %363 = vector.broadcast %cst_64 : f32 to vector<8x128xf32>
    %364 = arith.subf %363, %357 : vector<8x128xf32>
    %365 = arith.mulf %364, %362 : vector<8x128xf32>
    %366 = arith.mulf %357, %337 : vector<8x128xf32>
    %367 = arith.addf %365, %366 : vector<8x128xf32>
    %368 = vector.extract_strided_slice %214 {offsets = [40, 0], sizes = [8, 384], strides = [1, 1]} : vector<48x384xf32> to vector<8x384xf32>
    %cst_65 = arith.constant dense<0.000000e+00> : vector<8x384xf32>
    %369 = tpu.matmul %367, %215, %cst_65 {dimension_numbers = #tpu.dot_dimension_numbers<[1], [0], [0], [1], [0, 0, 1, 1], [], []>} : vector<8x128xf32>, vector<128x384xf32>, vector<8x384xf32> -> vector<8x384xf32>
    %370 = vector.broadcast %216 : vector<1x384xf32> to vector<8x384xf32>
    %371 = arith.addf %369, %370 : vector<8x384xf32>
    %372 = vector.extract_strided_slice %368 {offsets = [0, 0], sizes = [8, 128], strides = [1, 1]} : vector<8x384xf32> to vector<8x128xf32>
    %373 = vector.extract_strided_slice %371 {offsets = [0, 0], sizes = [8, 128], strides = [1, 1]} : vector<8x384xf32> to vector<8x128xf32>
    %374 = arith.addf %372, %373 : vector<8x128xf32>
    %375 = arith.negf %374 : vector<8x128xf32>
    %376 = math.exp %375 : vector<8x128xf32>
    %cst_66 = arith.constant 1.000000e+00 : f32
    %377 = vector.broadcast %cst_66 : f32 to vector<8x128xf32>
    %378 = arith.addf %377, %376 : vector<8x128xf32>
    %379 = arith.divf %377, %378 : vector<8x128xf32>
    %380 = vector.extract_strided_slice %368 {offsets = [0, 128], sizes = [8, 128], strides = [1, 1]} : vector<8x384xf32> to vector<8x128xf32>
    %381 = vector.extract_strided_slice %371 {offsets = [0, 128], sizes = [8, 128], strides = [1, 1]} : vector<8x384xf32> to vector<8x128xf32>
    %382 = arith.addf %380, %381 : vector<8x128xf32>
    %383 = arith.negf %382 : vector<8x128xf32>
    %384 = math.exp %383 : vector<8x128xf32>
    %cst_67 = arith.constant 1.000000e+00 : f32
    %385 = vector.broadcast %cst_67 : f32 to vector<8x128xf32>
    %386 = arith.addf %385, %384 : vector<8x128xf32>
    %387 = arith.divf %385, %386 : vector<8x128xf32>
    %388 = vector.extract_strided_slice %368 {offsets = [0, 256], sizes = [8, 128], strides = [1, 1]} : vector<8x384xf32> to vector<8x128xf32>
    %389 = vector.extract_strided_slice %371 {offsets = [0, 256], sizes = [8, 128], strides = [1, 1]} : vector<8x384xf32> to vector<8x128xf32>
    %390 = arith.mulf %379, %389 : vector<8x128xf32>
    %391 = arith.addf %388, %390 : vector<8x128xf32>
    %392 = math.tanh %391 : vector<8x128xf32>
    %cst_68 = arith.constant 1.000000e+00 : f32
    %393 = vector.broadcast %cst_68 : f32 to vector<8x128xf32>
    %394 = arith.subf %393, %387 : vector<8x128xf32>
    %395 = arith.mulf %394, %392 : vector<8x128xf32>
    %396 = arith.mulf %387, %367 : vector<8x128xf32>
    %397 = arith.addf %395, %396 : vector<8x128xf32>
    %398 = tpu.concatenate %247, %277, %307, %337, %367, %397 in 0 : vector<8x128xf32>, vector<8x128xf32>, vector<8x128xf32>, vector<8x128xf32>, vector<8x128xf32>, vector<8x128xf32> -> vector<48x128xf32>
    %c712 = arith.constant 712 : index
    %c0_69 = arith.constant 0 : index
    %399 = vector.load %arg1[%c712, %c0_69] : memref<888x384xf32, #tpu.memory_space<vmem>>, vector<128x32xf32>
    %cst_70 = arith.constant dense<0.000000e+00> : vector<48x32xf32>
    %400 = tpu.matmul %398, %399, %cst_70 {dimension_numbers = #tpu.dot_dimension_numbers<[1], [0], [0], [1], [0, 0, 1, 1], [], []>} : vector<48x128xf32>, vector<128x32xf32>, vector<48x32xf32> -> vector<48x32xf32>
    %c840 = arith.constant 840 : index
    %c0_71 = arith.constant 0 : index
    %401 = vector.load %arg1[%c840, %c0_71] : memref<888x384xf32, #tpu.memory_space<vmem>>, vector<1x32xf32>
    %402 = vector.broadcast %401 : vector<1x32xf32> to vector<48x32xf32>
    %403 = arith.addf %400, %402 : vector<48x32xf32>
    %cst_72 = arith.constant 0.000000e+00 : f32
    %404 = vector.broadcast %cst_72 : f32 to vector<48x32xf32>
    %405 = arith.maximumf %403, %404 : vector<48x32xf32>
    %c848 = arith.constant 848 : index
    %c0_73 = arith.constant 0 : index
    %406 = vector.load %arg1[%c848, %c0_73] : memref<888x384xf32, #tpu.memory_space<vmem>>, vector<32x11xf32>
    %cst_74 = arith.constant dense<0.000000e+00> : vector<48x11xf32>
    %407 = tpu.matmul %405, %406, %cst_74 {dimension_numbers = #tpu.dot_dimension_numbers<[1], [0], [0], [1], [0, 0, 1, 1], [], []>} : vector<48x32xf32>, vector<32x11xf32>, vector<48x11xf32> -> vector<48x11xf32>
    %c880 = arith.constant 880 : index
    %c0_75 = arith.constant 0 : index
    %408 = vector.load %arg1[%c880, %c0_75] : memref<888x384xf32, #tpu.memory_space<vmem>>, vector<1x11xf32>
    %409 = vector.broadcast %408 : vector<1x11xf32> to vector<48x11xf32>
    %410 = arith.addf %407, %409 : vector<48x11xf32>
    %c0_76 = arith.constant 0 : index
    %c0_77 = arith.constant 0 : index
    %411 = vector.load %arg2[%c0_76, %c0_77] : memref<48x11xf32, #tpu.memory_space<vmem>>, vector<48x11xf32>
    tpu.vector_store %arg2[%c0_76, %c0_77], %410 {strides = array<i32>} : memref<48x11xf32, #tpu.memory_space<vmem>>, vector<48x11xf32>,
    return
  }
}

</mosaic_0001>

<bundles_post_ra>
// kernel: progressive_forward.1
= control target key start
LH: loop header
LB: loop body
LE: loop exit
PB: predicated region body
PF: predicated region fallthrough
CT: control target
= control target key end

     0   :  { %7 = vsyncpa [#allocation3], 0  ;;  %s5195_s9 = smov [#allocation2]   ;;  %s6030_s0 = inlined_call_operand.vmem [shape: f32[48,80], index: 0, kind: input, shape index: {}]   ;;  %s6031_s1 = inlined_call_operand.hbm [shape: f32[888,384], index: 1, kind: input, shape index: {}]   ;;  %s6032_s2 = inlined_call_operand.vmem [shape: f32[48,11], index: 2, kind: output, shape index: {}]  }
   0x1   :  { %s15_s10 = sshll.u32 %s5195_s9, 4  ;;  %s5171_s13 = scalar_lea.hbm %s6031_s1, 42624  ;;  %s16_s10 = int_to_ptr.vmem [resolvable:$true] %s15_s10 }
   0x2   :  { %p5172_p0 = scmp.ne.s32.totalorder %s6031_s1, %s5171_s13  ;;  %p5175_p1 = scmp.lt.u32.totalorder %s5171_s13, %s6031_s1 }
   0x4   :  { %p5177_p2 = pnand %p5175_p1, %p5172_p0 }
   0x6   :  { %5180 = shalt.err (!%p5177_p2)
}
   0x7   :  { %s5181_s18 = scalar_lea.vmem %s16_s10, 42624  ;;  %p5186_p4 = scmp.lt.s32.totalorder %s16_s10, %s16_s10 }
   0x8   :  { %p5182_p3 = scmp.ne.s32.totalorder %s16_s10, %s5181_s18  ;;  %p5187_p5 = scmp.lt.s32.totalorder %s5181_s18, %s5181_s18 }
   0xa   :  { %p5188_p6 = por %p5187_p5, %p5186_p4 }
   0xc   :  { %p5189_p7 = pnand %p5188_p6, %p5182_p3 }
   0xe   :  { %5192 = shalt.err (!%p5189_p7)
}
   0xf   :  { %s5196_s19 = smov 384   ;;  %s5197_s20 = smov 24  }
  0x10   :  { %21 = dma.hbm_to_vmem [thread:$0]  %s6031_s1, 42624, %s16_s10, [#allocation3], %s5196_s19, %s5196_s19, %s5197_s20  }
  0x11   :  { %5193 = dma.done.wait [#allocation3], 42624  }
  0x12   :  { %5194 = vsyncadd [#allocation3], 4294924672  ;;  %v31_v0 = vld [vmem:[#allocation2] sm:$0xff]  ;;  %v32_v1 = vld [vmem:[#allocation2 + $0x18] sm:$0xff]  ;;  %vm42_vm0 = vcmask 654336   ;;  %v5198_v63 = vmov 0.0  }
  0x13   :  { %v33_v2 = vld [vmem:[#allocation2 + $0x30] sm:$0xff]  ;;  %v4113_v3 = vpack.c.bf16 %v32_v1, %v31_v0  ;;  %v34_v4 = vld [vmem:[#allocation2 + $0x48] sm:$0xff]  ;;  %v35_v6 = vld [vmem:[#allocation2 + $0x60] sm:$0xff]  ;;  %293 = vmatprep.mubr.f32.mxu1 %v5198_v63  ;;  %v5199_v0 = vmov 0.0|0.0   ;;  %vm210_vm1 = vcmask 588800   ;;  %vm5200_vm2 = vmmov 0  }
  0x14   :  { %v4117_v5 = vpack.c.bf16 %v34_v4, %v33_v2  ;;  %v36_v7 = vld [vmem:[#allocation2 + $0x78] sm:$0xff]  ;;  %v25_v8 = vld [vmem:[%s6030_s0] sm:$0xff]  ;;  %v37_v10 = vld [vmem:[#allocation2 + $0x90] sm:$0xff]  ;;  %vm3012_vm4 = vcmask 261120   ;;  %vm3126_vm5 = vcmask 89088  }
  0x15   :  { %4114 = vmatprep.subr.bf16.mxu0 %v4113_v3  ;;  %3517 = vmatprep.mubr.msk.f32.mxu0 %vm42_vm0, %v25_v8  ;;  %v4121_v9 = vpack.c.bf16 %v36_v7, %v35_v6  ;;  %v166_v11 = vld [vmem:[#allocation2 + $0x110] sm:$0xff]  ;;  %v169_v12 = vld [vmem:[#allocation2 + $0x128] sm:$0xff]  ;;  %v168_v16 = vld [vmem:[#allocation2 + $0x120] sm:$0xff] }
  0x16   :  { %4116 = vmatpush3.bf16.msra.mxu0 %v4113_v3  ;;  %v38_v13 = vld [vmem:[#allocation2 + $0xa8] sm:$0xff]  ;;  %v4133_v14 = vpack.c.bf16 %v169_v12, %v166_v11  ;;  %v172_v18 = vld [vmem:[#allocation2 + $0x140] sm:$0xff]  ;;  %v175_v19 = vld [vmem:[#allocation2 + $0x158] sm:$0xff] }
  0x17   :  { %4118 = vmatprep.subr.bf16.mxu0 %v4117_v5  ;;  %v165_v15 = vld [vmem:[#allocation2 + $0x108] sm:$0xff]  ;;  %v4137_v20 = vpack.c.bf16 %v175_v19, %v172_v18  ;;  %v171_v21 = vld [vmem:[#allocation2 + $0x138] sm:$0xff]  ;;  %v174_v22 = vld [vmem:[#allocation2 + $0x150] sm:$0xff]  ;;  %v4125_v23 = vpack.c.bf16 %v38_v13, %v37_v10 }
  0x18   :  { %v4135_v17 = vpack.c.bf16 %v168_v16, %v165_v15  ;;  %4134 = vmatprep.subr.bf16.mxu1 %v4133_v14  ;;  %v39_v24 = vld [vmem:[#allocation2 + $0xc0] sm:$0xff]  ;;  %v4139_v25 = vpack.c.bf16 %v174_v22, %v171_v21  ;;  %v178_v26 = vld [vmem:[#allocation2 + $0x170] sm:$0xff]  ;;  %v181_v27 = vld [vmem:[#allocation2 + $0x188] sm:$0xff] }
  0x19   :  { %v40_v28 = vld [vmem:[#allocation2 + $0xd8] sm:$0xff]  ;;  %v4141_v29 = vpack.c.bf16 %v181_v27, %v178_v26  ;;  %v177_v30 = vld [vmem:[#allocation2 + $0x168] sm:$0xff]  ;;  %v180_v31 = vld [vmem:[#allocation2 + $0x180] sm:$0xff] }
  0x1a   :  { %4120 = vmatpush3.bf16.msra.mxu0 %v4117_v5  ;;  %4136 = vmatpush1.bf16.msra.mxu1 %v4135_v17  ;;  %v184_v32 = vld [vmem:[#allocation2 + $0x1a0] sm:$0xff]  ;;  %v187_v33 = vld [vmem:[#allocation2 + $0x1b8] sm:$0xff]  ;;  %v4129_v34 = vpack.c.bf16 %v40_v28, %v39_v24  ;;  %v4143_v35 = vpack.c.bf16 %v180_v31, %v177_v30  ;;  %v170_v37 = vld [vmem:[#allocation2 + $0x130] sm:$0xff] }
  0x1b   :  { %4122 = vmatprep.subr.bf16.mxu0 %v4121_v9  ;;  %4138 = vmatprep.subr.bf16.mxu1 %v4137_v20  ;;  %v167_v36 = vld [vmem:[#allocation2 + $0x118] sm:$0xff]  ;;  %v4145_v38 = vpack.c.bf16 %v187_v33, %v184_v32  ;;  %v173_v40 = vld [vmem:[#allocation2 + $0x148] sm:$0xff]  ;;  %v176_v41 = vld [vmem:[#allocation2 + $0x160] sm:$0xff] }
  0x1c   :  { %v4149_v39 = vpack.c.bf16 %v170_v37, %v167_v36  ;;  %v26_v42 = vld [vmem:[%s6030_s0 + $0x8] sm:$0xff]  ;;  %v27_v43 = vld [vmem:[%s6030_s0 + $0x10] sm:$0xff]  ;;  %v4153_v44 = vpack.c.bf16 %v176_v41, %v173_v40  ;;  %v179_v45 = vld [vmem:[#allocation2 + $0x178] sm:$0xff] }
  0x1d   :  { %v182_v46 = vld [vmem:[#allocation2 + $0x190] sm:$0xff]  ;;  %v28_v47 = vld [vmem:[%s6030_s0 + $0x18] sm:$0xff]  ;;  %v29_v48 = vld [vmem:[%s6030_s0 + $0x20] sm:$0xff] }
  0x1e   :  { %4124 = vmatpush3.bf16.msra.mxu0 %v4121_v9  ;;  %4140 = vmatpush1.bf16.msra.mxu1 %v4139_v25  ;;  %v4157_v49 = vpack.c.bf16 %v182_v46, %v179_v45  ;;  %v30_v50 = vld [vmem:[%s6030_s0 + $0x28] sm:$0xff]  ;;  %v183_v51 = vld [vmem:[#allocation2 + $0x198] sm:$0xff]  ;;  %v186_v52 = vld [vmem:[#allocation2 + $0x1b0] sm:$0xff] }
  0x1f   :  { %4126 = vmatprep.subr.bf16.mxu0 %v4125_v23  ;;  %4142 = vmatprep.subr.bf16.mxu1 %v4141_v29  ;;  %v4147_v53 = vpack.c.bf16 %v186_v52, %v183_v51  ;;  %v185_v54 = vld [vmem:[#allocation2 + $0x1a8] sm:$0xff]  ;;  %v188_v55 = vld [vmem:[#allocation2 + $0x1c0] sm:$0xff]  ;;  %v190_v57 = vld [vmem:[#allocation2 + $0x1d0] sm:$0xff] }
  0x20   :  { %v4161_v56 = vpack.c.bf16 %v188_v55, %v185_v54  ;;  %v426_v58 = vld [vmem:[#allocation2 + $0x200] sm:$0xff]  ;;  %v429_v59 = vld [vmem:[#allocation2 + $0x218] sm:$0xff]  ;;  %v189_v60 = vld [vmem:[#allocation2 + $0x1c8] sm:$0xff] }
  0x21   :  { %v5252_v61 = vpack.c.bf16 %v429_v59, %v426_v58  ;;  %v191_v62 = vld [vmem:[#allocation2 + $0x1d8] sm:$0xff]  ;;  %v41_v1 = vld [vmem:[#allocation2 + $0xf0] ss:$0 sm:$0xff]  ;;  %v435_v8 = vld [vmem:[#allocation2 + $0x248] sm:$0xff] }
  0x22   :  { %4128 = vmatpush3.bf16.msra.mxu0 %v4125_v23  ;;  %4144 = vmatpush1.bf16.msra.mxu1 %v4143_v35  ;;  %v425_v3 = vld [vmem:[#allocation2 + $0x1f8] sm:$0xff]  ;;  %v428_v4 = vld [vmem:[#allocation2 + $0x210] sm:$0xff]  ;;  %v427_v10 = vld [vmem:[#allocation2 + $0x208] sm:$0xff] }
  0x23   :  { %4130 = vmatprep.subr.bf16.mxu0 %v4129_v34  ;;  %4146 = vmatprep.subr.bf16.mxu1 %v4145_v38  ;;  %v432_v7 = vld [vmem:[#allocation2 + $0x230] sm:$0xff]  ;;  %v430_v11 = vld [vmem:[#allocation2 + $0x220] sm:$0xff]  ;;  %v5257_v12 = vpack.c.bf16 %v428_v4, %v425_v3  ;;  %v431_v16 = vld [vmem:[#allocation2 + $0x228] sm:$0xff] }
  0x24   :  { %v5259_v14 = vpack.c.bf16 %v435_v8, %v432_v7  ;;  %v434_v17 = vld [vmem:[#allocation2 + $0x240] sm:$0xff]  ;;  %v441_v22 = vld [vmem:[#allocation2 + $0x278] sm:$0xff]  ;;  %v5261_v23 = vpack.c.bf16 %v430_v11, %v427_v10  ;;  %v440_v30 = vld [vmem:[#allocation2 + $0x270] sm:$0xff] }
  0x25   :  { %v438_v21 = vld [vmem:[#allocation2 + $0x260] sm:$0xff]  ;;  %v5267_v25 = vpack.c.bf16 %v434_v17, %v431_v16  ;;  %v437_v29 = vld [vmem:[#allocation2 + $0x258] sm:$0xff]  ;;  %v444_v32 = vld [vmem:[#allocation2 + $0x290] sm:$0xff] }
  0x26   :  { %4132 = vmatpush3.bf16.msra.mxu0 %v4129_v34  ;;  %4148 = vmatpush1.bf16.msra.mxu1 %v4147_v53  ;;  %v5271_v28 = vpack.c.bf16 %v441_v22, %v438_v21  ;;  %v447_v33 = vld [vmem:[#allocation2 + $0x2a8] sm:$0xff]  ;;  %v433_v37 = vld [vmem:[#allocation2 + $0x238] sm:$0xff]  ;;  %v436_v38 = vld [vmem:[#allocation2 + $0x250] sm:$0xff] }
  0x27   :  { %4150 = vmatprep.subr.bf16.mxu0 %v4149_v39  ;;  %245 = vmatprep.subr.mxu1 %v190_v57  ;;  %v5283_v40 = vpack.c.bf16 %v447_v33, %v444_v32  ;;  %v450_v45 = vld [vmem:[#allocation2 + $0x2c0] sm:$0xff]  ;;  %v453_v46 = vld [vmem:[#allocation2 + $0x2d8] sm:$0xff]  ;;  %v452_v53 = vld [vmem:[#allocation2 + $0x2d0] sm:$0xff]  ;;  %v162_v33 = vlaneseq }
  0x28   :  { %v5297_v51 = vpack.c.bf16 %v453_v46, %v450_v45  ;;  %v449_v52 = vld [vmem:[#allocation2 + $0x2b8] sm:$0xff]  ;;  %v456_v54 = vld [vmem:[#allocation2 + $0x2f0] sm:$0xff]  ;;  %v459_v55 = vld [vmem:[#allocation2 + $0x308] sm:$0xff] }
  0x29   :  { %3518 = vmatmul.mubr.msk.f32.vlgmr.msra.gmra.mrb[0].mxu0 %vm42_vm0, %v26_v42  ;;  %v443_v42 = vld [vmem:[#allocation2 + $0x288] sm:$0xff]  ;;  %v445_v57 = vld [vmem:[#allocation2 + $0x298] sm:$0xff]  ;;  %v448_v58 = vld [vmem:[#allocation2 + $0x2b0] sm:$0xff]  ;;  %v5308_v59 = vpack.c.bf16 %v452_v53, %v449_v52 }
  0x2a   :  { %3520 = vmatprep.mubr.msk.f32.mxu0 %vm42_vm0, %v27_v43  ;;  %4152 = vmatpush3.bf16.msra.mxu0 %v4149_v39  ;;  %v5279_v39 = vpack.c.bf16 %v440_v30, %v437_v29  ;;  %v446_v43 = vld [vmem:[#allocation2 + $0x2a0] sm:$0xff]  ;;  %v465_v3 = vld [vmem:[#allocation2 + $0x338] sm:$0xff]  ;;  %v5315_v4 = vpack.c.bf16 %v448_v58, %v445_v57  ;;  %v464_v10 = vld [vmem:[#allocation2 + $0x330] sm:$0xff] }
  0x2b   :  { %4154 = vmatprep.subr.bf16.mxu0 %v4153_v44  ;;  %246 = vmatpush1.msra.mxu1 %v189_v60  ;;  %v5312_v60 = vpack.c.bf16 %v459_v55, %v456_v54  ;;  %v468_v11 = vld [vmem:[#allocation2 + $0x350] sm:$0xff]  ;;  %v457_v16 = vld [vmem:[#allocation2 + $0x2f8] sm:$0xff]  ;;  %v470_v21 = vld [vmem:[#allocation2 + $0x360] sm:$0xff] }
  0x2c   :  { %4166 = vmatprep.subr.bf16.mxu1 %v5252_v61  ;;  %v460_v17 = vld [vmem:[#allocation2 + $0x310] sm:$0xff]  ;;  %v469_v30 = vld [vmem:[#allocation2 + $0x358] sm:$0xff] }
  0x2d   :  { %3521 = vmatmul.mubr.msk.f32.gmra.mrb[2].mxu0 %vm42_vm0, %v28_v47  ;;  %v5288_v47 = vpack.c.bf16 %v436_v38, %v433_v37  ;;  %v5339_v22 = vpack.c.bf16 %v460_v17, %v457_v16  ;;  %v474_v55 = vld [vmem:[#allocation2 + $0x378] ss:$8 sm:$0x7] }
  0x2e   :  { %3523 = vmatprep.mubr.msk.f32.mxu0 %vm42_vm0, %v29_v48  ;;  %4156 = vmatpush3.bf16.msra.mxu0 %v4153_v44  ;;  %v439_v48 = vld [vmem:[#allocation2 + $0x268] sm:$0xff] }
  0x2f   :  { %4158 = vmatprep.subr.bf16.mxu0 %v4157_v49 }
  0x31   :  { %3524 = vmatmul.mubr.msk.f32.gmra.mrb[4].mxu0 %vm42_vm0, %v30_v50  ;;  %v5293_v50 = vpack.c.bf16 %v446_v43, %v443_v42 }
  0x32   :  { %4160 = vmatpush3.bf16.msra.mxu0 %v4157_v49  ;;  %v442_v49 = vld [vmem:[#allocation2 + $0x280] sm:$0xff] }
  0x33   :  { %4162 = vmatprep.subr.bf16.mxu0 %v4161_v56 }
  0x36   :  { %4164 = vmatpush3.bf16.msra.mxu0 %v4161_v56  ;;  %v5301_v56 = vpack.c.bf16 %v442_v49, %v439_v48 }
  0x37   :  { %3542 = vmatprep.subr.mxu0 %v191_v62 }
  0x3a   :  { %3543 = vmatpush3.msra.mxu0 %v191_v62  ;;  %v455_v62 = vld [vmem:[#allocation2 + $0x2e8] sm:$0xff] }
  0x3b   :  { %4197 = vmatprep.subr.bf16.mxu0 %v5199_v0 }
  0xfc   :  { %v3519_v2 = vpop.f32.mrb[0].mxu0 }
  0xfd   :  { %v133_v5 = vadd.f32 %v3519_v2, %v41_v1  ;;  %v127_v6 = vpop.f32.mrb[1].mxu0  ;;  %v462_v2 = vld [vmem:[#allocation2 + $0x320] sm:$0xff] }
  0xfe   :  { %v128_v9 = vadd.f32 %v127_v6, %v41_v1  ;;  %v454_v6 = vld [vmem:[#allocation2 + $0x2e0] sm:$0xff]  ;;  %v5324_v8 = vpack.c.bf16 %v465_v3, %v462_v2 }
  0xff   :  { %v157_v18 = vmax.f32 %v133_v5, 0.0  ;;  %v451_v5 = vld [vmem:[#allocation2 + $0x2c8] sm:$0xff] }
 0x100   :  { %v156_v13 = vmax.f32 %v128_v9, 0.0  ;;  %v3522_v15 = vpop.f32.mrb[2].mxu0  ;;  %v461_v9 = vld [vmem:[#allocation2 + $0x318] sm:$0xff] }
 0x101   :  { %v143_v19 = vadd.f32 %v3522_v15, %v41_v1  ;;  %v137_v20 = vpop.f32.mrb[3].mxu0  ;;  %v5327_v15 = vpack.c.bf16 %v454_v6, %v451_v5 }
 0x102   :  { %3144 = vmatmul.mubr.msk.f32.vlgmr.msra.gmra.mrb[0].mxu1 %vm210_vm1, %v156_v13  ;;  %3544 = vmatprep.mubr.msk.f32.mxu0 %vm210_vm1, %v156_v13  ;;  %v138_v24 = vadd.f32 %v137_v20, %v41_v1  ;;  %v471_v13 = vld [vmem:[#allocation2 + $0x368] sm:$0xff] }
 0x103   :  { %4168 = vmatpush1.bf16.msra.mxu1 %v5257_v12  ;;  %3545 = vmatmul.mubr.msk.f32.vlgmr.msra.gmra.mrb[6].mxu0 %vm210_vm1, %v157_v18  ;;  %v159_v26 = vmax.f32 %v143_v19, 0.0  ;;  %v5336_v19 = vpack.c.bf16 %v471_v13, %v468_v11  ;;  %v467_v20 = vld [vmem:[#allocation2 + $0x348] sm:$0xff] }
 0x104   :  { %299 = vmatprep.mubr.f32.mxu1 %v5198_v63  ;;  %4170 = vmatprep.subr.bf16.mxu1 %v5259_v14  ;;  %v158_v27 = vmax.f32 %v138_v24, 0.0  ;;  %v3525_v31 = vpop.f32.mrb[4].mxu0  ;;  %v463_v24 = vld [vmem:[#allocation2 + $0x328] sm:$0xff] }
 0x105   :  { %v5273_v34 = vadd.f32 %v3525_v31, %v41_v1  ;;  %v147_v35 = vpop.f32.mrb[5].mxu0  ;;  %4199 = vmatpush3.bf16.msra.mxu0 %v5261_v23  ;;  %v472_v31 = vld [vmem:[#allocation2 + $0x370] sm:$0xff] }
 0x106   :  { %3145 = vmatmul.mubr.msk.f32.gmra.mrb[2].mxu1 %vm210_vm1, %v157_v18  ;;  %3547 = vmatprep.mubr.msk.f32.mxu0 %vm210_vm1, %v158_v27  ;;  %v148_v36 = vadd.f32 %v147_v35, %v41_v1  ;;  %v458_v1 = vld [vmem:[#allocation2 + $0x300] sm:$0xff]  ;;  %v5332_v18 = vpack.c.bf16 %v464_v10, %v461_v9  ;;  %v5353_v32 = vpack.c.bf16 %v472_v31, %v469_v30 }
 0x107   :  { %4172 = vmatpush1.bf16.msra.mxu1 %v5267_v25  ;;  %305 = vmatprep.mubr.f32.mxu1 %v5198_v63  ;;  %v161_v41 = vmax.f32 %v5273_v34, 0.0  ;;  %v5320_v7 = vpack.c.bf16 %v458_v1, %v455_v62  ;;  %v196_v34 = vshrl.u32 %v162_v33, 7 }
 0x108   :  { %4174 = vmatprep.subr.bf16.mxu1 %v5271_v28  ;;  %v160_v44 = vmax.f32 %v148_v36, 0.0  ;;  %3548 = vmatmul.mubr.msk.f32.gmra.mrb[8].mxu0 %vm210_vm1, %v159_v26  ;;  %v193_v36 = vld [vmem:[#allocation2 + $0x1e0] ss:$8 sm:$0x7] }
 0x109   :  { %4200 = vmatprep.subr.bf16.mxu0 %v5199_v0  ;;  %v5396_v35 = vsub.s32 2, %v196_v34  ;;  %v5409_v54 = vsub.s32 0, %v196_v34  ;;  %v5411_v57 = vsub.s32 1, %v196_v34 }
 0x10a   :  { %3146 = vmatmul.mubr.msk.f32.gmra.mrb[4].mxu1 %vm210_vm1, %v158_v27  ;;  %3550 = vmatprep.mubr.msk.f32.mxu0 %vm210_vm1, %v160_v44  ;;  %v5343_v27 = vpack.c.bf16 %v470_v21, %v467_v20 }
 0x10b   :  { %4176 = vmatpush1.bf16.msra.mxu1 %v5279_v39  ;;  %311 = vmatprep.mubr.f32.mxu1 %v5198_v63  ;;  %v206_v37 = vrot.slane %v193_v36, %v5396_v35  ;;  %v198_v58 = vrot.slane %v193_v36, %v5409_v54  ;;  %v479_v62 = vrot.slane %v474_v55, %v5409_v54 }
 0x10c   :  { %4178 = vmatprep.subr.bf16.mxu1 %v5283_v40  ;;  %3551 = vmatmul.mubr.msk.f32.gmra.mrb[10].mxu0 %vm210_vm1, %v161_v41  ;;  %v202_v1 = vrot.slane %v193_v36, %v5411_v57  ;;  %v483_v2 = vrot.slane %v474_v55, %v5411_v57 }
 0x10d   :  { %4202 = vmatpush3.bf16.msra.mxu0 %v5288_v47  ;;  %3585 = vmatprep.mubr.msk.f32.mxu0 %vm5200_vm2, %v5198_v63  ;;  %v5417_v3 = vadd.f32 %v479_v62, %v198_v58 }
 0x10e   :  { %3147 = vmatmul.mubr.msk.f32.gmra.mrb[6].mxu1 %vm210_vm1, %v159_v26  ;;  %4203 = vmatprep.subr.bf16.mxu0 %v5199_v0  ;;  %v466_v26 = vld [vmem:[#allocation2 + $0x340] sm:$0xff]  ;;  %v5419_v6 = vadd.f32 %v483_v2, %v202_v1 }
 0x10f   :  { %4180 = vmatpush1.bf16.msra.mxu1 %v5293_v50  ;;  %317 = vmatprep.mubr.f32.mxu1 %v5198_v63  ;;  %v5347_v29 = vpack.c.bf16 %v466_v26, %v463_v24  ;;  %v5424_v26 = vrot.slane %v474_v55, %v5396_v35 }
 0x110   :  { %4182 = vmatprep.subr.bf16.mxu1 %v5297_v51 }
 0x111   :  { %4205 = vmatpush3.bf16.msra.mxu0 %v5301_v56 }
 0x112   :  { %3148 = vmatmul.mubr.msk.f32.gmra.mrb[8].mxu1 %vm210_vm1, %v160_v44  ;;  %4206 = vmatprep.subr.bf16.mxu0 %v5199_v0 }
 0x113   :  { %4184 = vmatpush1.bf16.msra.mxu1 %v5308_v59  ;;  %323 = vmatprep.mubr.f32.mxu1 %v5198_v63 }
 0x114   :  { %4186 = vmatprep.subr.bf16.mxu1 %v5312_v60 }
 0x115   :  { %4208 = vmatpush3.bf16.msra.mxu0 %v5315_v4 }
 0x116   :  { %3149 = vmatmul.mubr.msk.f32.gmra.mrb[10].mxu1 %vm210_vm1, %v161_v41  ;;  %4209 = vmatprep.subr.bf16.mxu0 %v5199_v0 }
 0x117   :  { %4188 = vmatpush1.bf16.msra.mxu1 %v5320_v7  ;;  %555 = vmatprep.mubr.f32.mxu1 %v5198_v63 }
 0x118   :  { %4190 = vmatprep.subr.bf16.mxu1 %v5324_v8 }
 0x119   :  { %4211 = vmatpush3.bf16.msra.mxu0 %v5327_v15 }
 0x11a   :  { %4212 = vmatprep.subr.bf16.mxu0 %v5199_v0 }
 0x11b   :  { %4192 = vmatpush1.bf16.msra.mxu1 %v5332_v18 }
 0x11c   :  { %4194 = vmatprep.subr.bf16.mxu1 %v5336_v19 }
 0x11d   :  { %4214 = vmatpush3.bf16.msra.mxu0 %v5339_v22 }
 0x11e   :  { %4215 = vmatprep.subr.bf16.mxu0 %v5199_v0 }
 0x11f   :  { %4196 = vmatpush1.bf16.msra.mxu1 %v5343_v27 }
 0x120   :  { %4222 = vmatprep.subr.bf16.mxu1 %v5252_v61 }
 0x121   :  { %4217 = vmatpush3.bf16.msra.mxu0 %v5347_v29 }
 0x122   :  { %556 = vmatmul.mubr.f32.vlgmr.msra.gmra.mrb[0].mxu1 %v5198_v63  ;;  %4218 = vmatprep.subr.bf16.mxu0 %v5199_v0 }
 0x123   :  { %4224 = vmatpush1.bf16.msra.mxu1 %v5257_v12  ;;  %717 = vmatprep.mubr.f32.mxu1 %v5198_v63 }
 0x124   :  { %4226 = vmatprep.subr.bf16.mxu1 %v5259_v14 }
 0x125   :  { %4220 = vmatpush3.bf16.msra.mxu0 %v5353_v32 }
 0x126   :  { %4253 = vmatprep.subr.bf16.mxu0 %v5199_v0 }
 0x127   :  { %4228 = vmatpush1.bf16.msra.mxu1 %v5267_v25 }
 0x128   :  { %3586 = vmatmul.mubr.f32.vlgmr.msra.gmra.mrb[12].mxu0 %v5198_v63  ;;  %4230 = vmatprep.subr.bf16.mxu1 %v5271_v28 }
 0x129   :  { %4255 = vmatpush3.bf16.msra.mxu0 %v5261_v23  ;;  %3620 = vmatprep.mubr.msk.f32.mxu0 %vm5200_vm2, %v5198_v63 }
 0x12a   :  { %4256 = vmatprep.subr.bf16.mxu0 %v5199_v0 }
 0x12b   :  { %4232 = vmatpush1.bf16.msra.mxu1 %v5279_v39 }
 0x12c   :  { %4234 = vmatprep.subr.bf16.mxu1 %v5283_v40 }
 0x12d   :  { %4258 = vmatpush3.bf16.msra.mxu0 %v5288_v47 }
 0x12e   :  { %4259 = vmatprep.subr.bf16.mxu0 %v5199_v0 }
 0x12f   :  { %4236 = vmatpush1.bf16.msra.mxu1 %v5293_v50 }
 0x130   :  { %4238 = vmatprep.subr.bf16.mxu1 %v5297_v51 }
 0x131   :  { %4261 = vmatpush3.bf16.msra.mxu0 %v5301_v56 }
 0x132   :  { %4262 = vmatprep.subr.bf16.mxu0 %v5199_v0 }
 0x133   :  { %4240 = vmatpush1.bf16.msra.mxu1 %v5308_v59 }
 0x134   :  { %4242 = vmatprep.subr.bf16.mxu1 %v5312_v60 }
 0x135   :  { %4264 = vmatpush3.bf16.msra.mxu0 %v5315_v4 }
 0x136   :  { %4265 = vmatprep.subr.bf16.mxu0 %v5199_v0 }
 0x137   :  { %4244 = vmatpush1.bf16.msra.mxu1 %v5320_v7 }
 0x138   :  { %4246 = vmatprep.subr.bf16.mxu1 %v5324_v8 }
 0x139   :  { %4267 = vmatpush3.bf16.msra.mxu0 %v5327_v15 }
 0x13a   :  { %4268 = vmatprep.subr.bf16.mxu0 %v5199_v0 }
 0x13b   :  { %4248 = vmatpush1.bf16.msra.mxu1 %v5332_v18 }
 0x13c   :  { %4250 = vmatprep.subr.bf16.mxu1 %v5336_v19 }
 0x13d   :  { %4270 = vmatpush3.bf16.msra.mxu0 %v5339_v22 }
 0x13e   :  { %4271 = vmatprep.subr.bf16.mxu0 %v5199_v0 }
 0x13f   :  { %4252 = vmatpush1.bf16.msra.mxu1 %v5343_v27 }
 0x140   :  { %4278 = vmatprep.subr.bf16.mxu1 %v5252_v61 }
 0x141   :  { %4273 = vmatpush3.bf16.msra.mxu0 %v5347_v29 }
 0x142   :  { %4274 = vmatprep.subr.bf16.mxu0 %v5199_v0 }
 0x145   :  { %4276 = vmatpush3.bf16.msra.mxu0 %v5353_v32 }
 0x146   :  { %4309 = vmatprep.subr.bf16.mxu0 %v5199_v0 }
 0x1d6   :  { %v3546_v38 = vpop.f32.mrb[6].mxu0 }
 0x1d7   :  { %v5399_v41 = vadd.f32 %v3546_v38, %v206_v37  ;;  %v396_v42 = vpop.f32.mrb[7].mxu0 }
 0x1d8   :  { %v397_v38 = vadd.f32 %v396_v42, %v206_v37 }
 0x1db   :  { %v3549_v43 = vpop.f32.mrb[8].mxu0 }
 0x1dc   :  { %v5401_v44 = vadd.f32 %v3549_v43, %v206_v37  ;;  %v406_v45 = vpop.f32.mrb[9].mxu0 }
 0x1dd   :  { %v5403_v46 = vadd.f32 %v406_v45, %v206_v37 }
 0x1df   :  { %v3552_v48 = vpop.f32.mrb[10].mxu0 }
 0x1e0   :  { %v5405_v49 = vadd.f32 %v3552_v48, %v206_v37  ;;  %v416_v52 = vpop.f32.mrb[11].mxu0 }
 0x1e1   :  { %v5407_v53 = vadd.f32 %v416_v52, %v206_v37 }
 0x1f5   :  { %v557_v5 = vpop.f32.mrb[0].mxu1 }
 0x1f6   :  { %v4974_v9 = vadd.f32 %v5417_v3, %v557_v5  ;;  %v559_v10 = vpop.f32.mrb[1].mxu1 }
 0x1f7   :  { %v4976_v13 = vadd.f32 %v5419_v6, %v559_v10 }
 0x1f8   :  { %v3156_v11 = vmul.f32 -1.442695, %v4974_v9 }
 0x1f9   :  { %v3157_v20 = vmul.f32 -1.442695, %v4976_v13 }
 0x1fa   :  { %5051 = vpow2.f32 %v3156_v11 }
 0x1fb   :  { %v628_v16 = vpop.f32.mrb[12].mxu0  ;;  %5053 = vpow2.f32 %v3157_v20 }
 0x1fc   :  { %v3587_v17 = vpop.f32.mrb[13].mxu0  ;;  %v629_v34 = vadd.f32 %v628_v16, %v5424_v26 }
 0x204   :  { %v5052_v21 = vpop.eup %5051 }
 0x205   :  { %v636_v24 = vadd.f32 1.0, %v5052_v21  ;;  %v5054_v30 = vpop.eup %5053 }
 0x206   :  { %v643_v31 = vadd.f32 1.0, %v5054_v30 }
 0x207   :  { %5055 = vrcp.f32 %v636_v24 }
 0x208   :  { %5057 = vrcp.f32 %v643_v31 }
 0x211   :  { %v5056_v36 = vpop.eup %5055 }
 0x212   :  { %v646_v43 = vmul.f32 %v5056_v36, %v629_v34  ;;  %v5058_v48 = vpop.eup %5057 }
 0x213   :  { %v649_v52 = vsub.f32 1.0, %v5058_v48  ;;  %v651_v1 = vmul.f32 0.0, %v5058_v48 }
 0x214   :  { %v647_v45 = vadd.f32 %v646_v43, %v397_v38 }
 0x216   :  { %5059 = vtanh.f32 %v647_v45 }
 0x220   :  { %v5060_v58 = vpop.eup %5059 }
 0x221   :  { %v650_v62 = vmul.f32 %v5060_v58, %v649_v52 }
 0x223   :  { %v5427_v2 = vadd.f32 %v651_v1, %v650_v62 }
 0x225   :  { %718 = vmatmul.mubr.f32.vlgmr.msra.gmra.mrb[2].mxu1 %v5427_v2  ;;  %3621 = vmatmul.mubr.f32.vlgmr.msra.gmra.mrb[14].mxu0 %v5427_v2 }
 0x226   :  { %4280 = vmatpush1.bf16.msra.mxu1 %v5257_v12  ;;  %4311 = vmatpush3.bf16.msra.mxu0 %v5261_v23 }
 0x227   :  { %4282 = vmatprep.subr.bf16.mxu1 %v5259_v14  ;;  %4312 = vmatprep.subr.bf16.mxu0 %v5199_v0 }
 0x228   :  { %879 = vmatprep.mubr.f32.mxu1 %v5198_v63  ;;  %3655 = vmatprep.mubr.msk.f32.mxu0 %vm5200_vm2, %v5198_v63 }
 0x22a   :  { %4284 = vmatpush1.bf16.msra.mxu1 %v5267_v25  ;;  %4314 = vmatpush3.bf16.msra.mxu0 %v5288_v47 }
 0x22b   :  { %4286 = vmatprep.subr.bf16.mxu1 %v5271_v28  ;;  %4315 = vmatprep.subr.bf16.mxu0 %v5199_v0 }
 0x22e   :  { %4288 = vmatpush1.bf16.msra.mxu1 %v5279_v39  ;;  %4317 = vmatpush3.bf16.msra.mxu0 %v5301_v56 }
 0x22f   :  { %4290 = vmatprep.subr.bf16.mxu1 %v5283_v40  ;;  %4318 = vmatprep.subr.bf16.mxu0 %v5199_v0 }
 0x232   :  { %4292 = vmatpush1.bf16.msra.mxu1 %v5293_v50  ;;  %4320 = vmatpush3.bf16.msra.mxu0 %v5315_v4 }
 0x233   :  { %4294 = vmatprep.subr.bf16.mxu1 %v5297_v51  ;;  %4321 = vmatprep.subr.bf16.mxu0 %v5199_v0 }
 0x236   :  { %4296 = vmatpush1.bf16.msra.mxu1 %v5308_v59  ;;  %4323 = vmatpush3.bf16.msra.mxu0 %v5327_v15 }
 0x237   :  { %4298 = vmatprep.subr.bf16.mxu1 %v5312_v60  ;;  %4324 = vmatprep.subr.bf16.mxu0 %v5199_v0 }
 0x23a   :  { %4300 = vmatpush1.bf16.msra.mxu1 %v5320_v7  ;;  %4326 = vmatpush3.bf16.msra.mxu0 %v5339_v22 }
 0x23b   :  { %4302 = vmatprep.subr.bf16.mxu1 %v5324_v8  ;;  %4327 = vmatprep.subr.bf16.mxu0 %v5199_v0 }
 0x23e   :  { %4304 = vmatpush1.bf16.msra.mxu1 %v5332_v18  ;;  %4329 = vmatpush3.bf16.msra.mxu0 %v5347_v29 }
 0x23f   :  { %4306 = vmatprep.subr.bf16.mxu1 %v5336_v19  ;;  %4330 = vmatprep.subr.bf16.mxu0 %v5199_v0 }
 0x242   :  { %4308 = vmatpush1.bf16.msra.mxu1 %v5343_v27  ;;  %4332 = vmatpush3.bf16.msra.mxu0 %v5353_v32 }
 0x243   :  { %4334 = vmatprep.subr.bf16.mxu1 %v5252_v61  ;;  %4365 = vmatprep.subr.bf16.mxu0 %v5199_v0 }
 0x2f8   :  { %v719_v37 = vpop.f32.mrb[2].mxu1  ;;  %v790_v42 = vpop.f32.mrb[14].mxu0 }
 0x2f9   :  { %v4978_v55 = vadd.f32 %v5417_v3, %v719_v37  ;;  %v721_v5 = vpop.f32.mrb[3].mxu1  ;;  %v3622_v9 = vpop.f32.mrb[15].mxu0  ;;  %v791_v24 = vadd.f32 %v790_v42, %v5424_v26 }
 0x2fa   :  { %v4980_v11 = vadd.f32 %v5419_v6, %v721_v5 }
 0x2fb   :  { %v3158_v10 = vmul.f32 -1.442695, %v4978_v55 }
 0x2fc   :  { %v3159_v13 = vmul.f32 -1.442695, %v4980_v11 }
 0x2fd   :  { %5061 = vpow2.f32 %v3158_v10 }
 0x2fe   :  { %5063 = vpow2.f32 %v3159_v13 }
 0x307   :  { %v5062_v16 = vpop.eup %5061 }
 0x308   :  { %v798_v17 = vadd.f32 1.0, %v5062_v16  ;;  %v5064_v20 = vpop.eup %5063 }
 0x309   :  { %v805_v21 = vadd.f32 1.0, %v5064_v20 }
 0x30a   :  { %5065 = vrcp.f32 %v798_v17 }
 0x30b   :  { %5067 = vrcp.f32 %v805_v21 }
 0x314   :  { %v5066_v30 = vpop.eup %5065 }
 0x315   :  { %v808_v31 = vmul.f32 %v5066_v30, %v791_v24  ;;  %v5068_v36 = vpop.eup %5067 }
 0x316   :  { %v811_v38 = vsub.f32 1.0, %v5068_v36  ;;  %v813_v48 = vmul.f32 %v5068_v36, %v5427_v2 }
 0x317   :  { %v809_v34 = vadd.f32 %v808_v31, %v5399_v41 }
 0x319   :  { %5069 = vtanh.f32 %v809_v34 }
 0x323   :  { %v5070_v43 = vpop.eup %5069 }
 0x324   :  { %v812_v45 = vmul.f32 %v5070_v43, %v811_v38 }
 0x326   :  { %v5471_v52 = vadd.f32 %v813_v48, %v812_v45 }
 0x328   :  { %880 = vmatmul.mubr.f32.vlgmr.msra.gmra.mrb[4].mxu1 %v5471_v52  ;;  %3656 = vmatmul.mubr.f32.vlgmr.msra.gmra.mrb[16].mxu0 %v5471_v52 }
 0x329   :  { %4336 = vmatpush1.bf16.msra.mxu1 %v5257_v12  ;;  %4367 = vmatpush3.bf16.msra.mxu0 %v5261_v23 }
 0x32a   :  { %4338 = vmatprep.subr.bf16.mxu1 %v5259_v14  ;;  %4368 = vmatprep.subr.bf16.mxu0 %v5199_v0 }
 0x32b   :  { %1041 = vmatprep.mubr.f32.mxu1 %v5198_v63  ;;  %3690 = vmatprep.mubr.msk.f32.mxu0 %vm5200_vm2, %v5198_v63 }
 0x32d   :  { %4340 = vmatpush1.bf16.msra.mxu1 %v5267_v25  ;;  %4370 = vmatpush3.bf16.msra.mxu0 %v5288_v47 }
 0x32e   :  { %4342 = vmatprep.subr.bf16.mxu1 %v5271_v28  ;;  %4371 = vmatprep.subr.bf16.mxu0 %v5199_v0 }
 0x331   :  { %4344 = vmatpush1.bf16.msra.mxu1 %v5279_v39  ;;  %4373 = vmatpush3.bf16.msra.mxu0 %v5301_v56 }
 0x332   :  { %4346 = vmatprep.subr.bf16.mxu1 %v5283_v40  ;;  %4374 = vmatprep.subr.bf16.mxu0 %v5199_v0 }
 0x335   :  { %4348 = vmatpush1.bf16.msra.mxu1 %v5293_v50  ;;  %4376 = vmatpush3.bf16.msra.mxu0 %v5315_v4 }
 0x336   :  { %4350 = vmatprep.subr.bf16.mxu1 %v5297_v51  ;;  %4377 = vmatprep.subr.bf16.mxu0 %v5199_v0 }
 0x339   :  { %4352 = vmatpush1.bf16.msra.mxu1 %v5308_v59  ;;  %4379 = vmatpush3.bf16.msra.mxu0 %v5327_v15 }
 0x33a   :  { %4354 = vmatprep.subr.bf16.mxu1 %v5312_v60  ;;  %4380 = vmatprep.subr.bf16.mxu0 %v5199_v0 }
 0x33d   :  { %4356 = vmatpush1.bf16.msra.mxu1 %v5320_v7  ;;  %4382 = vmatpush3.bf16.msra.mxu0 %v5339_v22 }
 0x33e   :  { %4358 = vmatprep.subr.bf16.mxu1 %v5324_v8  ;;  %4383 = vmatprep.subr.bf16.mxu0 %v5199_v0 }
 0x341   :  { %4360 = vmatpush1.bf16.msra.mxu1 %v5332_v18  ;;  %4385 = vmatpush3.bf16.msra.mxu0 %v5347_v29 }
 0x342   :  { %4362 = vmatprep.subr.bf16.mxu1 %v5336_v19  ;;  %4386 = vmatprep.subr.bf16.mxu0 %v5199_v0 }
 0x345   :  { %4364 = vmatpush1.bf16.msra.mxu1 %v5343_v27  ;;  %4388 = vmatpush3.bf16.msra.mxu0 %v5353_v32 }
 0x346   :  { %4390 = vmatprep.subr.bf16.mxu1 %v5252_v61  ;;  %4421 = vmatprep.subr.bf16.mxu0 %v5199_v0 }
 0x3fb   :  { %v881_v41 = vpop.f32.mrb[4].mxu1  ;;  %v952_v58 = vpop.f32.mrb[16].mxu0 }
 0x3fc   :  { %v4982_v62 = vadd.f32 %v5417_v3, %v881_v41  ;;  %v883_v1 = vpop.f32.mrb[5].mxu1  ;;  %v3657_v37 = vpop.f32.mrb[17].mxu0  ;;  %v953_v16 = vadd.f32 %v952_v58, %v5424_v26 }
 0x3fd   :  { %v4984_v55 = vadd.f32 %v5419_v6, %v883_v1 }
 0x3fe   :  { %v3160_v42 = vmul.f32 -1.442695, %v4982_v62 }
 0x3ff   :  { %v3161_v5 = vmul.f32 -1.442695, %v4984_v55 }
 0x400   :  { %5071 = vpow2.f32 %v3160_v42 }
 0x401   :  { %5073 = vpow2.f32 %v3161_v5 }
 0x40a   :  { %v5072_v9 = vpop.eup %5071 }
 0x40b   :  { %v960_v10 = vadd.f32 1.0, %v5072_v9  ;;  %v5074_v11 = vpop.eup %5073 }
 0x40c   :  { %v967_v13 = vadd.f32 1.0, %v5074_v11 }
 0x40d   :  { %5075 = vrcp.f32 %v960_v10 }
 0x40e   :  { %5077 = vrcp.f32 %v967_v13 }
 0x417   :  { %v5076_v17 = vpop.eup %5075 }
 0x418   :  { %v970_v20 = vmul.f32 %v5076_v17, %v953_v16  ;;  %v5078_v24 = vpop.eup %5077 }
 0x419   :  { %v973_v30 = vsub.f32 1.0, %v5078_v24  ;;  %v975_v36 = vmul.f32 %v5078_v24, %v5471_v52 }
 0x41a   :  { %v971_v21 = vadd.f32 %v970_v20, %v5403_v46 }
 0x41c   :  { %5079 = vtanh.f32 %v971_v21 }
 0x426   :  { %v5080_v31 = vpop.eup %5079 }
 0x427   :  { %v974_v34 = vmul.f32 %v5080_v31, %v973_v30 }
 0x429   :  { %v5515_v38 = vadd.f32 %v975_v36, %v974_v34 }
 0x42b   :  { %1042 = vmatmul.mubr.f32.vlgmr.msra.gmra.mrb[6].mxu1 %v5515_v38  ;;  %3691 = vmatmul.mubr.f32.vlgmr.msra.gmra.mrb[18].mxu0 %v5515_v38 }
 0x42c   :  { %4392 = vmatpush1.bf16.msra.mxu1 %v5257_v12  ;;  %4423 = vmatpush3.bf16.msra.mxu0 %v5261_v23 }
 0x42d   :  { %4394 = vmatprep.subr.bf16.mxu1 %v5259_v14  ;;  %4424 = vmatprep.subr.bf16.mxu0 %v5199_v0 }
 0x42e   :  { %1203 = vmatprep.mubr.f32.mxu1 %v5198_v63  ;;  %3725 = vmatprep.mubr.msk.f32.mxu0 %vm5200_vm2, %v5198_v63 }
 0x430   :  { %4396 = vmatpush1.bf16.msra.mxu1 %v5267_v25  ;;  %4426 = vmatpush3.bf16.msra.mxu0 %v5288_v47 }
 0x431   :  { %4398 = vmatprep.subr.bf16.mxu1 %v5271_v28  ;;  %4427 = vmatprep.subr.bf16.mxu0 %v5199_v0 }
 0x434   :  { %4400 = vmatpush1.bf16.msra.mxu1 %v5279_v39  ;;  %4429 = vmatpush3.bf16.msra.mxu0 %v5301_v56 }
 0x435   :  { %4402 = vmatprep.subr.bf16.mxu1 %v5283_v40  ;;  %4430 = vmatprep.subr.bf16.mxu0 %v5199_v0 }
 0x438   :  { %4404 = vmatpush1.bf16.msra.mxu1 %v5293_v50  ;;  %4432 = vmatpush3.bf16.msra.mxu0 %v5315_v4 }
 0x439   :  { %4406 = vmatprep.subr.bf16.mxu1 %v5297_v51  ;;  %4433 = vmatprep.subr.bf16.mxu0 %v5199_v0 }
 0x43c   :  { %4408 = vmatpush1.bf16.msra.mxu1 %v5308_v59  ;;  %4435 = vmatpush3.bf16.msra.mxu0 %v5327_v15 }
 0x43d   :  { %4410 = vmatprep.subr.bf16.mxu1 %v5312_v60  ;;  %4436 = vmatprep.subr.bf16.mxu0 %v5199_v0 }
 0x440   :  { %4412 = vmatpush1.bf16.msra.mxu1 %v5320_v7  ;;  %4438 = vmatpush3.bf16.msra.mxu0 %v5339_v22 }
 0x441   :  { %4414 = vmatprep.subr.bf16.mxu1 %v5324_v8  ;;  %4439 = vmatprep.subr.bf16.mxu0 %v5199_v0 }
 0x444   :  { %4416 = vmatpush1.bf16.msra.mxu1 %v5332_v18  ;;  %4441 = vmatpush3.bf16.msra.mxu0 %v5347_v29 }
 0x445   :  { %4418 = vmatprep.subr.bf16.mxu1 %v5336_v19  ;;  %4442 = vmatprep.subr.bf16.mxu0 %v5199_v0 }
 0x448   :  { %4420 = vmatpush1.bf16.msra.mxu1 %v5343_v27  ;;  %4444 = vmatpush3.bf16.msra.mxu0 %v5353_v32 }
 0x449   :  { %4446 = vmatprep.subr.bf16.mxu1 %v5252_v61  ;;  %4477 = vmatprep.subr.bf16.mxu0 %v5199_v0 }
 0x4fe   :  { %v1043_v46 = vpop.f32.mrb[6].mxu1  ;;  %v1114_v43 = vpop.f32.mrb[18].mxu0 }
 0x4ff   :  { %v4986_v45 = vadd.f32 %v5417_v3, %v1043_v46  ;;  %v1045_v48 = vpop.f32.mrb[7].mxu1  ;;  %v3692_v41 = vpop.f32.mrb[19].mxu0  ;;  %v1115_v61 = vadd.f32 %v1114_v43, %v5424_v26  ;;  %v1467_v46 = vld [vmem:[#allocation2 + $0x3f0] sm:$0xff]  ;;  %v1468_v43 = vld [vmem:[#allocation2 + $0x408] sm:$0xff] }
 0x500   :  { %v4988_v62 = vadd.f32 %v5419_v6, %v1045_v48  ;;  %v1470_v48 = vld [vmem:[#allocation2 + $0x438] sm:$0xff] }
 0x501   :  { %v3162_v58 = vmul.f32 -1.442695, %v4986_v45  ;;  %v1469_v45 = vld [vmem:[#allocation2 + $0x420] sm:$0xff] }
 0x502   :  { %v3163_v1 = vmul.f32 -1.442695, %v4988_v62  ;;  %v4513_v41 = vpack.c.bf16 %v1470_v48, %v1469_v45  ;;  %v1472_v62 = vld [vmem:[#allocation2 + $0x468] sm:$0xff]  ;;  %v1600_v45 = vld [vmem:[#allocation2 + $0x580] sm:$0xff] }
 0x503   :  { %5081 = vpow2.f32 %v3162_v58  ;;  %v1471_v58 = vld [vmem:[#allocation2 + $0x450] sm:$0xff] }
 0x504   :  { %5083 = vpow2.f32 %v3163_v1  ;;  %v4517_v1 = vpack.c.bf16 %v1472_v62, %v1471_v58  ;;  %v1623_v58 = vld [vmem:[#allocation2 + $0x638] sm:$0xff] }
 0x50d   :  { %v5082_v37 = vpop.eup %5081 }
 0x50e   :  { %v1122_v42 = vadd.f32 1.0, %v5082_v37  ;;  %v5084_v55 = vpop.eup %5083  ;;  %v1473_v37 = vld [vmem:[#allocation2 + $0x480] sm:$0xff] }
 0x50f   :  { %v1129_v5 = vadd.f32 1.0, %v5084_v55 }
 0x510   :  { %5085 = vrcp.f32 %v1122_v42  ;;  %v1474_v42 = vld [vmem:[#allocation2 + $0x498] sm:$0xff] }
 0x511   :  { %5087 = vrcp.f32 %v1129_v5  ;;  %v4521_v55 = vpack.c.bf16 %v1474_v42, %v1473_v37  ;;  %v1475_v5 = vld [vmem:[#allocation2 + $0x4b0] sm:$0xff] }
 0x512   :  { %v1622_v37 = vld [vmem:[#allocation2 + $0x630] sm:$0xff] }
 0x51a   :  { %v5086_v9 = vpop.eup %5085 }
 0x51b   :  { %v1132_v10 = vmul.f32 %v5086_v9, %v1115_v61  ;;  %v5088_v13 = vpop.eup %5087  ;;  %v1476_v61 = vld [vmem:[#allocation2 + $0x4c8] sm:$0xff] }
 0x51c   :  { %v1135_v16 = vsub.f32 1.0, %v5088_v13  ;;  %v1137_v21 = vmul.f32 %v5088_v13, %v5515_v38  ;;  %v4525_v9 = vpack.c.bf16 %v1476_v61, %v1475_v5  ;;  %v1606_v5 = vld [vmem:[#allocation2 + $0x5b0] sm:$0xff] }
 0x51d   :  { %v1133_v11 = vadd.f32 %v1132_v10, %v5401_v44  ;;  %v1466_v44 = vld [vmem:[#allocation2 + $0x3d8] sm:$0xff]  ;;  %v1477_v10 = vld [vmem:[#allocation2 + $0x4e0] sm:$0xff] }
 0x51f   :  { %5089 = vtanh.f32 %v1133_v11  ;;  %v1478_v11 = vld [vmem:[#allocation2 + $0x4f8] sm:$0xff] }
 0x520   :  { %v4529_v13 = vpack.c.bf16 %v1478_v11, %v1477_v10  ;;  %v1629_v10 = vld [vmem:[#allocation2 + $0x668] sm:$0xff] }
 0x529   :  { %v5090_v17 = vpop.eup %5089 }
 0x52a   :  { %v1136_v20 = vmul.f32 %v5090_v17, %v1135_v16  ;;  %v1590_v16 = vld [vmem:[#allocation2 + $0x530] sm:$0xff]  ;;  %v1593_v17 = vld [vmem:[#allocation2 + $0x548] sm:$0xff] }
 0x52c   :  { %v5559_v24 = vadd.f32 %v1137_v21, %v1136_v20  ;;  %v4533_v20 = vpack.c.bf16 %v1593_v17, %v1590_v16  ;;  %v1589_v21 = vld [vmem:[#allocation2 + $0x528] sm:$0xff]  ;;  %v1628_v16 = vld [vmem:[#allocation2 + $0x660] sm:$0xff] }
 0x52e   :  { %1204 = vmatmul.mubr.f32.vlgmr.msra.gmra.mrb[8].mxu1 %v5559_v24  ;;  %3726 = vmatmul.mubr.f32.vlgmr.msra.gmra.mrb[20].mxu0 %v5559_v24 }
 0x52f   :  { %4448 = vmatpush1.bf16.msra.mxu1 %v5257_v12  ;;  %4479 = vmatpush3.bf16.msra.mxu0 %v5261_v23  ;;  %v1463_v12 = vld [vmem:[#allocation2 + $0x390] sm:$0xff] }
 0x530   :  { %4450 = vmatprep.subr.bf16.mxu1 %v5259_v14  ;;  %4480 = vmatprep.subr.bf16.mxu0 %v5199_v0  ;;  %v1464_v14 = vld [vmem:[#allocation2 + $0x3a8] sm:$0xff] }
 0x531   :  { %1365 = vmatprep.mubr.f32.mxu1 %v5198_v63  ;;  %3760 = vmatprep.mubr.msk.f32.mxu0 %vm5200_vm2, %v5198_v63  ;;  %v4501_v23 = vpack.c.bf16 %v1464_v14, %v1463_v12  ;;  %v1592_v12 = vld [vmem:[#allocation2 + $0x540] sm:$0xff] }
 0x532   :  { %v4535_v14 = vpack.c.bf16 %v1592_v12, %v1589_v21  ;;  %v1612_v21 = vld [vmem:[#allocation2 + $0x5e0] sm:$0xff] }
 0x533   :  { %4452 = vmatpush1.bf16.msra.mxu1 %v5267_v25  ;;  %4482 = vmatpush3.bf16.msra.mxu0 %v5288_v47 }
 0x534   :  { %4454 = vmatprep.subr.bf16.mxu1 %v5271_v28  ;;  %4483 = vmatprep.subr.bf16.mxu0 %v5199_v0 }
 0x537   :  { %4456 = vmatpush1.bf16.msra.mxu1 %v5279_v39  ;;  %4485 = vmatpush3.bf16.msra.mxu0 %v5301_v56 }
 0x538   :  { %4458 = vmatprep.subr.bf16.mxu1 %v5283_v40  ;;  %4486 = vmatprep.subr.bf16.mxu0 %v5199_v0 }
 0x53b   :  { %4460 = vmatpush1.bf16.msra.mxu1 %v5293_v50  ;;  %4488 = vmatpush3.bf16.msra.mxu0 %v5315_v4 }
 0x53c   :  { %4462 = vmatprep.subr.bf16.mxu1 %v5297_v51  ;;  %4489 = vmatprep.subr.bf16.mxu0 %v5199_v0 }
 0x53f   :  { %4464 = vmatpush1.bf16.msra.mxu1 %v5308_v59  ;;  %4491 = vmatpush3.bf16.msra.mxu0 %v5327_v15 }
 0x540   :  { %4466 = vmatprep.subr.bf16.mxu1 %v5312_v60  ;;  %4492 = vmatprep.subr.bf16.mxu0 %v5199_v0 }
 0x543   :  { %4468 = vmatpush1.bf16.msra.mxu1 %v5320_v7  ;;  %4494 = vmatpush3.bf16.msra.mxu0 %v5339_v22 }
 0x544   :  { %4470 = vmatprep.subr.bf16.mxu1 %v5324_v8  ;;  %4495 = vmatprep.subr.bf16.mxu0 %v5199_v0 }
 0x547   :  { %4472 = vmatpush1.bf16.msra.mxu1 %v5332_v18  ;;  %4497 = vmatpush3.bf16.msra.mxu0 %v5347_v29 }
 0x548   :  { %4474 = vmatprep.subr.bf16.mxu1 %v5336_v19  ;;  %4498 = vmatprep.subr.bf16.mxu0 %v5199_v0 }
 0x54b   :  { %4476 = vmatpush1.bf16.msra.mxu1 %v5343_v27  ;;  %4500 = vmatpush3.bf16.msra.mxu0 %v5353_v32  ;;  %v1465_v32 = vld [vmem:[#allocation2 + $0x3c0] sm:$0xff] }
 0x54c   :  { %4502 = vmatprep.subr.bf16.mxu1 %v4501_v23  ;;  %v4505_v36 = vpack.c.bf16 %v1466_v44, %v1465_v32  ;;  %4534 = vmatprep.subr.bf16.mxu0 %v4533_v20  ;;  %v1614_v44 = vld [vmem:[#allocation2 + $0x5f0] sm:$0xff]  ;;  %v1609_v20 = vld [vmem:[#allocation2 + $0x5c8] sm:$0xff] }
 0x54d   :  { %v4577_v12 = vpack.c.bf16 %v1612_v21, %v1609_v20  ;;  %v1857_v21 = vld [vmem:[#allocation2 + $0x6f0] sm:$0xff] }
 0x601   :  { %v1205_v25 = vpop.f32.mrb[8].mxu1  ;;  %v1276_v28 = vpop.f32.mrb[20].mxu0 }
 0x602   :  { %v4990_v39 = vadd.f32 %v5417_v3, %v1205_v25  ;;  %v1207_v40 = vpop.f32.mrb[9].mxu1  ;;  %v3727_v47 = vpop.f32.mrb[21].mxu0  ;;  %v1277_v8 = vadd.f32 %v1276_v28, %v5424_v26  ;;  %v1599_v25 = vld [vmem:[#allocation2 + $0x578] sm:$0xff] }
 0x603   :  { %v4992_v51 = vadd.f32 %v5419_v6, %v1207_v40  ;;  %v1598_v40 = vld [vmem:[#allocation2 + $0x570] sm:$0xff] }
 0x604   :  { %v3164_v50 = vmul.f32 -1.442695, %v4990_v39  ;;  %v1595_v39 = vld [vmem:[#allocation2 + $0x558] sm:$0xff] }
 0x605   :  { %v3165_v56 = vmul.f32 -1.442695, %v4992_v51  ;;  %v4539_v47 = vpack.c.bf16 %v1598_v40, %v1595_v39  ;;  %v1605_v51 = vld [vmem:[#allocation2 + $0x5a8] sm:$0xff]  ;;  %v1634_v39 = vld [vmem:[#allocation2 + $0x690] sm:$0xff] }
 0x606   :  { %5091 = vpow2.f32 %v3164_v50  ;;  %v1602_v50 = vld [vmem:[#allocation2 + $0x590] sm:$0xff] }
 0x607   :  { %5093 = vpow2.f32 %v3165_v56  ;;  %v4541_v56 = vpack.c.bf16 %v1605_v51, %v1602_v50  ;;  %v1618_v50 = vld [vmem:[#allocation2 + $0x610] sm:$0xff] }
 0x610   :  { %v5092_v59 = vpop.eup %5091 }
 0x611   :  { %v1284_v60 = vadd.f32 1.0, %v5092_v59  ;;  %v5094_v4 = vpop.eup %5093  ;;  %v1601_v59 = vld [vmem:[#allocation2 + $0x588] sm:$0xff] }
 0x612   :  { %v1291_v7 = vadd.f32 1.0, %v5094_v4 }
 0x613   :  { %5095 = vrcp.f32 %v1284_v60  ;;  %v1604_v60 = vld [vmem:[#allocation2 + $0x5a0] sm:$0xff] }
 0x614   :  { %5097 = vrcp.f32 %v1291_v7  ;;  %v4543_v4 = vpack.c.bf16 %v1604_v60, %v1601_v59  ;;  %v1608_v7 = vld [vmem:[#allocation2 + $0x5c0] sm:$0xff] }
 0x615   :  { %v1624_v59 = vld [vmem:[#allocation2 + $0x640] sm:$0xff] }
 0x61d   :  { %v5096_v15 = vpop.eup %5095 }
 0x61e   :  { %v1294_v18 = vmul.f32 %v5096_v15, %v1277_v8  ;;  %v5098_v22 = vpop.eup %5097  ;;  %v1611_v8 = vld [vmem:[#allocation2 + $0x5d8] sm:$0xff] }
 0x61f   :  { %v1297_v27 = vsub.f32 1.0, %v5098_v22  ;;  %v1299_v31 = vmul.f32 %v5098_v22, %v5559_v24  ;;  %v4545_v15 = vpack.c.bf16 %v1611_v8, %v1608_v7  ;;  %v1630_v7 = vld [vmem:[#allocation2 + $0x670] sm:$0xff] }
 0x620   :  { %v1295_v19 = vadd.f32 %v1294_v18, %v5407_v53  ;;  %v4509_v53 = vpack.c.bf16 %v1468_v43, %v1467_v46  ;;  %v1607_v18 = vld [vmem:[#allocation2 + $0x5b8] sm:$0xff]  ;;  %v1616_v46 = vld [vmem:[#allocation2 + $0x600] sm:$0xff] }
 0x622   :  { %5099 = vtanh.f32 %v1295_v19  ;;  %v1610_v19 = vld [vmem:[#allocation2 + $0x5d0] sm:$0xff] }
 0x623   :  { %v4547_v22 = vpack.c.bf16 %v1610_v19, %v1607_v18  ;;  %v1636_v18 = vld [vmem:[#allocation2 + $0x6a0] sm:$0xff] }
 0x62c   :  { %v5100_v29 = vpop.eup %5099 }
 0x62d   :  { %v1298_v30 = vmul.f32 %v5100_v29, %v1297_v27  ;;  %v1591_v27 = vld [vmem:[#allocation2 + $0x538] sm:$0xff]  ;;  %v1594_v29 = vld [vmem:[#allocation2 + $0x550] sm:$0xff] }
 0x62e   :  { %v4565_v32 = vpack.c.bf16 %v1594_v29, %v1591_v27  ;;  %v1855_v27 = vld [vmem:[#allocation2 + $0x6e0] sm:$0xff] }
 0x62f   :  { %v5601_v34 = vadd.f32 %v1299_v31, %v1298_v30  ;;  %v1617_v30 = vld [vmem:[#allocation2 + $0x608] sm:$0xff] }
 0x630   :  { %v4549_v31 = vpack.c.bf16 %v1617_v30, %v1614_v44 }
 0x631   :  { %1366 = vmatmul.mubr.f32.vlgmr.msra.gmra.mrb[10].mxu1 %v5601_v34  ;;  %3761 = vmatmul.mubr.f32.vlgmr.msra.gmra.mrb[22].mxu0 %v5601_v34 }
 0x632   :  { %4504 = vmatpush3.bf16.msra.mxu1 %v4501_v23  ;;  %3795 = vmatprep.mubr.f32.mxu1 %v5427_v2  ;;  %v1596_v23 = vld [vmem:[#allocation2 + $0x560] sm:$0xff] }
 0x633   :  { %4506 = vmatprep.subr.bf16.mxu1 %v4505_v36  ;;  %1719 = vmatprep.mubr.f32.mxu0 %v5198_v63  ;;  %v4537_v28 = vpack.c.bf16 %v1599_v25, %v1596_v23  ;;  %v1635_v23 = vld [vmem:[#allocation2 + $0x698] sm:$0xff] }
 0x634   :  { %4536 = vmatpush1.bf16.msra.mxu0 %v4535_v14  ;;  %v1632_v14 = vld [vmem:[#allocation2 + $0x680] sm:$0xff] }
 0x635   :  { %4538 = vmatprep.subr.bf16.mxu0 %v4537_v28  ;;  %v4561_v25 = vpack.c.bf16 %v1635_v23, %v1632_v14  ;;  %v1631_v28 = vld [vmem:[#allocation2 + $0x678] sm:$0xff] }
 0x636   :  { %4508 = vmatpush3.bf16.msra.mxu1 %v4505_v36  ;;  %v1613_v36 = vld [vmem:[#allocation2 + $0x5e8] sm:$0xff]  ;;  %v4563_v40 = vpack.c.bf16 %v1634_v39, %v1631_v28  ;;  %v1867_v39 = vld [vmem:[#allocation2 + $0x740] sm:$0xff] }
 0x637   :  { %4510 = vmatprep.subr.bf16.mxu1 %v4509_v53  ;;  %v4551_v43 = vpack.c.bf16 %v1616_v46, %v1613_v36  ;;  %v1864_v28 = vld [vmem:[#allocation2 + $0x728] sm:$0xff] }
 0x638   :  { %4540 = vmatpush1.bf16.msra.mxu0 %v4539_v47  ;;  %v1615_v47 = vld [vmem:[#allocation2 + $0x5f8] sm:$0xff] }
 0x639   :  { %4542 = vmatprep.subr.bf16.mxu0 %v4541_v56  ;;  %v4581_v51 = vpack.c.bf16 %v1618_v50, %v1615_v47  ;;  %v1621_v56 = vld [vmem:[#allocation2 + $0x628] sm:$0xff]  ;;  %v5640_v50 = vpack.c.bf16 %v1867_v39, %v1864_v28  ;;  %v1862_v28 = vld [vmem:[#allocation2 + $0x718] sm:$0xff] }
 0x63a   :  { %4512 = vmatpush3.bf16.msra.mxu1 %v4509_v53  ;;  %v1597_v53 = vld [vmem:[#allocation2 + $0x568] sm:$0xff]  ;;  %v4585_v60 = vpack.c.bf16 %v1624_v59, %v1621_v56 }
 0x63b   :  { %4514 = vmatprep.subr.bf16.mxu1 %v4513_v41  ;;  %v4569_v48 = vpack.c.bf16 %v1600_v45, %v1597_v53 }
 0x63c   :  { %4544 = vmatpush1.bf16.msra.mxu0 %v4543_v4  ;;  %v1627_v4 = vld [vmem:[#allocation2 + $0x658] sm:$0xff] }
 0x63d   :  { %4546 = vmatprep.subr.bf16.mxu0 %v4545_v15  ;;  %v4589_v8 = vpack.c.bf16 %v1630_v7, %v1627_v4  ;;  %v1633_v15 = vld [vmem:[#allocation2 + $0x688] sm:$0xff]  ;;  %v1866_v4 = vld [vmem:[#allocation2 + $0x738] sm:$0xff] }
 0x63e   :  { %4516 = vmatpush3.bf16.msra.mxu1 %v4513_v41  ;;  %v1620_v41 = vld [vmem:[#allocation2 + $0x620] sm:$0xff]  ;;  %v4593_v19 = vpack.c.bf16 %v1636_v18, %v1633_v15  ;;  %v1873_v15 = vld [vmem:[#allocation2 + $0x770] sm:$0xff] }
 0x63f   :  { %4518 = vmatprep.subr.bf16.mxu1 %v4517_v1  ;;  %v4553_v62 = vpack.c.bf16 %v1623_v58, %v1620_v41 }
 0x640   :  { %4548 = vmatpush1.bf16.msra.mxu0 %v4547_v22  ;;  %v1852_v22 = vld [vmem:[#allocation2 + $0x6c8] sm:$0xff] }
 0x641   :  { %4550 = vmatprep.subr.bf16.mxu0 %v4549_v31  ;;  %v5612_v29 = vpack.c.bf16 %v1855_v27, %v1852_v22 }
 0x642   :  { %4520 = vmatpush3.bf16.msra.mxu1 %v4517_v1  ;;  %v1619_v1 = vld [vmem:[#allocation2 + $0x618] sm:$0xff] }
 0x643   :  { %4522 = vmatprep.subr.bf16.mxu1 %v4521_v55  ;;  %v4555_v42 = vpack.c.bf16 %v1622_v37, %v1619_v1 }
 0x644   :  { %4552 = vmatpush1.bf16.msra.mxu0 %v4551_v43 }
 0x645   :  { %4554 = vmatprep.subr.bf16.mxu0 %v4553_v62 }
 0x646   :  { %4524 = vmatpush3.bf16.msra.mxu1 %v4521_v55  ;;  %v1603_v55 = vld [vmem:[#allocation2 + $0x598] sm:$0xff] }
 0x647   :  { %4526 = vmatprep.subr.bf16.mxu1 %v4525_v9  ;;  %v4573_v61 = vpack.c.bf16 %v1606_v5, %v1603_v55  ;;  %v5622_v55 = vand.u32 127, %v162_v33 }
 0x648   :  { %4556 = vmatpush1.bf16.msra.mxu0 %v4555_v42  ;;  %v5619_v42 = vld [vmem:[#allocation2 + $0x510] ss:$0 sm:$0xff] }
 0x649   :  { %vm164_vm3 = vcmp.ge.s32.totalorder %v5622_v55, 64  ;;  %v1638_v55 = vld [vmem:[#allocation2 + $0x6a8] ss:$8 sm:$0x7] }
 0x64a   :  { %4528 = vmatpush3.bf16.msra.mxu1 %v4525_v9  ;;  %v1626_v9 = vld [vmem:[#allocation2 + $0x650] sm:$0xff] }
 0x64b   :  { %4530 = vmatprep.subr.bf16.mxu1 %v4529_v13  ;;  %v4557_v11 = vpack.c.bf16 %v1629_v10, %v1626_v9  ;;  %v1854_v9 = vld [vmem:[#allocation2 + $0x6d8] sm:$0xff] }
 0x64d   :  { %4558 = vmatprep.subr.bf16.mxu0 %v4557_v11 }
 0x64e   :  { %4532 = vmatpush3.bf16.msra.mxu1 %v4529_v13  ;;  %v1625_v13 = vld [vmem:[#allocation2 + $0x648] sm:$0xff] }
 0x64f   :  { %4566 = vmatprep.subr.bf16.mxu1 %v4565_v32  ;;  %v4559_v17 = vpack.c.bf16 %v1628_v16, %v1625_v13  ;;  %v1861_v13 = vld [vmem:[#allocation2 + $0x710] sm:$0xff] }
 0x651   :  { %3796 = vmatmul.mubr.f32.vlgmr.msra.gmra.mrb[12].mxu1 %v5471_v52  ;;  %4560 = vmatpush1.bf16.msra.mxu0 %v4559_v17 }
 0x652   :  { %3798 = vmatprep.mubr.f32.mxu1 %v5515_v38  ;;  %4568 = vmatpush3.bf16.msra.mxu1 %v4565_v32 }
 0x653   :  { %4570 = vmatprep.subr.bf16.mxu1 %v4569_v48  ;;  %4562 = vmatprep.subr.bf16.mxu0 %v4561_v25 }
 0x655   :  { %3799 = vmatmul.mubr.f32.gmra.mrb[14].mxu1 %v5559_v24  ;;  %4564 = vmatpush1.bf16.msra.mxu0 %v4563_v40 }
 0x656   :  { %3801 = vmatprep.mubr.f32.mxu1 %v5601_v34  ;;  %4572 = vmatpush3.bf16.msra.mxu1 %v4569_v48 }
 0x657   :  { %4574 = vmatprep.subr.bf16.mxu1 %v4573_v61  ;;  %4598 = vmatprep.subr.bf16.mxu0 %v5612_v29 }
 0x65a   :  { %4576 = vmatpush3.bf16.msra.mxu1 %v4573_v61  ;;  %v1851_v61 = vld [vmem:[#allocation2 + $0x6c0] sm:$0xff] }
 0x65b   :  { %4578 = vmatprep.subr.bf16.mxu1 %v4577_v12  ;;  %v5627_v17 = vpack.c.bf16 %v1854_v9, %v1851_v61  ;;  %v1887_v9 = vld [vmem:[#allocation2 + $0x7e0] sm:$0xff] }
 0x65e   :  { %4580 = vmatpush3.bf16.msra.mxu1 %v4577_v12  ;;  %v1860_v12 = vld [vmem:[#allocation2 + $0x708] sm:$0xff] }
 0x65f   :  { %4582 = vmatprep.subr.bf16.mxu1 %v4581_v51  ;;  %v5637_v47 = vpack.c.bf16 %v1860_v12, %v1857_v21  ;;  %v1893_v12 = vld [vmem:[#allocation2 + $0x810] sm:$0xff] }
 0x662   :  { %4584 = vmatpush3.bf16.msra.mxu1 %v4581_v51 }
 0x663   :  { %4586 = vmatprep.subr.bf16.mxu1 %v4585_v60 }
 0x666   :  { %4588 = vmatpush3.bf16.msra.mxu1 %v4585_v60  ;;  %v1863_v60 = vld [vmem:[#allocation2 + $0x720] sm:$0xff] }
 0x667   :  { %4590 = vmatprep.subr.bf16.mxu1 %v4589_v8  ;;  %v5650_v22 = vpack.c.bf16 %v1866_v4, %v1863_v60  ;;  %v1877_v4 = vld [vmem:[#allocation2 + $0x790] sm:$0xff] }
 0x66a   :  { %4592 = vmatpush3.bf16.msra.mxu1 %v4589_v8  ;;  %v1870_v8 = vld [vmem:[#allocation2 + $0x758] sm:$0xff] }
 0x66b   :  { %4594 = vmatprep.subr.bf16.mxu1 %v4593_v19 }
 0x66e   :  { %4596 = vmatpush3.bf16.msra.mxu1 %v4593_v19 }
 0x66f   :  { %4629 = vmatprep.subr.bf16.mxu1 %v5199_v0 }
 0x704   :  { %v1367_v32 = vpop.f32.mrb[10].mxu1  ;;  %v1438_v44 = vpop.f32.mrb[22].mxu0 }
 0x705   :  { %v4994_v30 = vadd.f32 %v5417_v3, %v1367_v32  ;;  %v1369_v31 = vpop.f32.mrb[11].mxu1  ;;  %v3762_v36 = vpop.f32.mrb[23].mxu0  ;;  %v1439_v62 = vadd.f32 %v1438_v44, %v5424_v26  ;;  %v1858_v26 = vld [vmem:[#allocation2 + $0x6f8] sm:$0xff]  ;;  %v5657_v44 = vpack.c.bf16 %v1873_v15, %v1870_v8  ;;  %v1883_v15 = vld [vmem:[#allocation2 + $0x7c0] sm:$0xff] }
 0x706   :  { %v4996_v43 = vadd.f32 %v5419_v6, %v1369_v31  ;;  %v5629_v33 = vpack.c.bf16 %v1861_v13, %v1858_v26  ;;  %v1872_v31 = vld [vmem:[#allocation2 + $0x768] sm:$0xff]  ;;  %v1853_v26 = vld [vmem:[#allocation2 + $0x6d0] sm:$0xff] }
 0x707   :  { %v3166_v46 = vmul.f32 -1.442695, %v4994_v30  ;;  %v1869_v30 = vld [vmem:[#allocation2 + $0x750] sm:$0xff]  ;;  %v1876_v36 = vld [vmem:[#allocation2 + $0x788] sm:$0xff] }
 0x708   :  { %v3167_v53 = vmul.f32 -1.442695, %v4996_v43  ;;  %v5662_v43 = vpack.c.bf16 %v1872_v31, %v1869_v30  ;;  %v1856_v13 = vld [vmem:[#allocation2 + $0x6e8] sm:$0xff]  ;;  %v1895_v31 = vld [vmem:[#allocation2 + $0x820] sm:$0xff] }
 0x709   :  { %5101 = vpow2.f32 %v3166_v46  ;;  %v1879_v46 = vld [vmem:[#allocation2 + $0x7a0] sm:$0xff] }
 0x70a   :  { %5103 = vpow2.f32 %v3167_v53  ;;  %v5668_v53 = vpack.c.bf16 %v1879_v46, %v1876_v36  ;;  %v1898_v36 = vld [vmem:[#allocation2 + $0x838] sm:$0xff] }
 0x70b   :  { %v5722_v46 = vpack.c.bf16 %v1898_v36, %v1895_v31 }
 0x713   :  { %v5102_v45 = vpop.eup %5101 }
 0x714   :  { %v1446_v48 = vadd.f32 1.0, %v5102_v45  ;;  %v5104_v41 = vpop.eup %5103  ;;  %v1875_v45 = vld [vmem:[#allocation2 + $0x780] sm:$0xff] }
 0x715   :  { %v1453_v58 = vadd.f32 1.0, %v5104_v41 }
 0x716   :  { %5105 = vrcp.f32 %v1446_v48  ;;  %v1878_v48 = vld [vmem:[#allocation2 + $0x798] sm:$0xff] }
 0x717   :  { %5107 = vrcp.f32 %v1453_v58  ;;  %v5673_v41 = vpack.c.bf16 %v1878_v48, %v1875_v45  ;;  %v1885_v58 = vld [vmem:[#allocation2 + $0x7d0] sm:$0xff] }
 0x720   :  { %v5106_v1 = vpop.eup %5105 }
 0x721   :  { %v1456_v37 = vmul.f32 %v5106_v1, %v1439_v62  ;;  %v5108_v40 = vpop.eup %5107  ;;  %v1881_v1 = vld [vmem:[#allocation2 + $0x7b0] sm:$0xff] }
 0x722   :  { %v1459_v59 = vsub.f32 1.0, %v5108_v40  ;;  %v1461_v19 = vmul.f32 %v5108_v40, %v5601_v34  ;;  %v1865_v40 = vld [vmem:[#allocation2 + $0x730] sm:$0xff] }
 0x723   :  { %v1457_v3 = vadd.f32 %v1456_v37, %v5405_v49  ;;  %v1884_v37 = vld [vmem:[#allocation2 + $0x7c8] sm:$0xff] }
 0x724   :  { %v3797_v6 = vpop.f32.mrb[12].mxu1 }
 0x725   :  { %5109 = vtanh.f32 %v1457_v3  ;;  %v1546_v5 = vpop.f32.mrb[13].mxu1  ;;  %v1552_v10 = vadd.f32 %v3797_v6, %v5619_v42  ;;  %v5678_v3 = vpack.c.bf16 %v1884_v37, %v1881_v1  ;;  %v1888_v6 = vld [vmem:[#allocation2 + $0x7e8] sm:$0xff] }
 0x726   :  { %v1547_v11 = vadd.f32 %v1546_v5, %v5619_v42  ;;  %v1891_v5 = vld [vmem:[#allocation2 + $0x800] sm:$0xff] }
 0x727   :  { %v1576_v14 = vmax.f32 %v1552_v10, 0.0  ;;  %v5682_v61 = vpack.c.bf16 %v1891_v5, %v1888_v6  ;;  %v1890_v10 = vld [vmem:[#allocation2 + $0x7f8] sm:$0xff] }
 0x728   :  { %v1575_v16 = vmax.f32 %v1547_v11, 0.0  ;;  %v3800_v49 = vpop.f32.mrb[14].mxu1  ;;  %v5684_v11 = vpack.c.bf16 %v1890_v10, %v1887_v9 }
 0x729   :  { %v1556_v20 = vpop.f32.mrb[15].mxu1  ;;  %v1562_v51 = vadd.f32 %v3800_v49, %v5619_v42  ;;  %v1894_v49 = vld [vmem:[#allocation2 + $0x818] sm:$0xff] }
 0x72a   :  { %v1557_v23 = vadd.f32 %v1556_v20, %v5619_v42  ;;  %v1583_v25 = vsel %vm164_vm3, %v1575_v16, %v5427_v2  ;;  %v1584_v2 = vsel %vm164_vm3, %v1576_v14, %v5471_v52  ;;  %v5687_v16 = vpack.c.bf16 %v1856_v13, %v1853_v26  ;;  %v1897_v20 = vld [vmem:[#allocation2 + $0x830] sm:$0xff]  ;;  %v1896_v14 = vld [vmem:[#allocation2 + $0x828] sm:$0xff] }
 0x72b   :  { %1720 = vmatmul.mubr.f32.vlgmr.msra.gmra.mrb[24].mxu0 %v1583_v25  ;;  %v1578_v27 = vmax.f32 %v1562_v51, 0.0  ;;  %v5691_v21 = vpack.c.bf16 %v1897_v20, %v1894_v49  ;;  %v1868_v51 = vld [vmem:[#allocation2 + $0x748] sm:$0xff]  ;;  %v1643_v26 = vrot.slane %v1638_v55, %v5409_v54  ;;  %v1647_v20 = vrot.slane %v1638_v55, %v5411_v57 }
 0x72c   :  { %1725 = vmatprep.mubr.f32.mxu0 %v5198_v63  ;;  %4600 = vmatpush1.bf16.msra.mxu0 %v5627_v17  ;;  %v1577_v56 = vmax.f32 %v1557_v23, 0.0  ;;  %v5693_v23 = vpack.c.bf16 %v1896_v14, %v1893_v12 }
 0x72d   :  { %4602 = vmatprep.subr.bf16.mxu0 %v5629_v33 }
 0x72e   :  { %v1585_v52 = vsel %vm164_vm3, %v1577_v56, %v5515_v38  ;;  %v1586_v38 = vsel %vm164_vm3, %v1578_v27, %v5559_v24  ;;  %v1882_v24 = vld [vmem:[#allocation2 + $0x7b8] sm:$0xff]  ;;  %v1871_v56 = vld [vmem:[#allocation2 + $0x760] sm:$0xff]  ;;  %v1889_v27 = vld [vmem:[#allocation2 + $0x7f0] sm:$0xff] }
 0x72f   :  { %v5110_v7 = vpop.eup %5109  ;;  %1726 = vmatmul.mubr.f32.gmra.mrb[26].mxu0 %v1584_v2  ;;  %v5676_v62 = vpack.c.bf16 %v1885_v58, %v1882_v24 }
 0x730   :  { %1731 = vmatprep.mubr.f32.mxu0 %v5198_v63  ;;  %v1460_v18 = vmul.f32 %v5110_v7, %v1459_v59  ;;  %4604 = vmatpush1.bf16.msra.mxu0 %v5637_v47  ;;  %v1874_v59 = vld [vmem:[#allocation2 + $0x778] sm:$0xff]  ;;  %v1880_v7 = vld [vmem:[#allocation2 + $0x7a8] sm:$0xff] }
 0x731   :  { %4606 = vmatprep.subr.bf16.mxu0 %v5640_v50  ;;  %v5706_v60 = vpack.c.bf16 %v1874_v59, %v1871_v56  ;;  %v5710_v8 = vpack.c.bf16 %v1880_v7, %v1877_v4 }
 0x732   :  { %v5655_v32 = vadd.f32 %v1461_v19, %v1460_v18  ;;  %v1886_v18 = vld [vmem:[#allocation2 + $0x7d8] sm:$0xff] }
 0x733   :  { %1732 = vmatmul.mubr.f32.gmra.mrb[28].mxu0 %v1585_v52  ;;  %v5714_v19 = vpack.c.bf16 %v1886_v18, %v1883_v15 }
 0x734   :  { %3802 = vmatmul.mubr.f32.gmra.mrb[16].mxu1 %v5655_v32  ;;  %1737 = vmatprep.mubr.f32.mxu0 %v5198_v63 }
 0x735   :  { %3836 = vmatprep.mubr.f32.mxu1 %v1583_v25  ;;  %4608 = vmatpush1.bf16.msra.mxu0 %v5650_v22  ;;  %v1859_v25 = vld [vmem:[#allocation2 + $0x700] sm:$0xff] }
 0x736   :  { %4610 = vmatprep.subr.bf16.mxu0 %v5657_v44  ;;  %v5697_v39 = vpack.c.bf16 %v1862_v28, %v1859_v25 }
 0x737   :  { %1738 = vmatmul.mubr.f32.gmra.mrb[30].mxu0 %v1586_v38 }
 0x738   :  { %3837 = vmatmul.mubr.f32.vlgmr.msra.gmra.mrb[18].mxu1 %v1584_v2  ;;  %1743 = vmatprep.mubr.f32.mxu0 %v5198_v63  ;;  %v5703_v2 = vpack.c.bf16 %v1868_v51, %v1865_v40 }
 0x739   :  { %3839 = vmatprep.mubr.f32.mxu1 %v1585_v52  ;;  %4612 = vmatpush1.bf16.msra.mxu0 %v5662_v43  ;;  %v1892_v52 = vld [vmem:[#allocation2 + $0x808] sm:$0xff] }
 0x73a   :  { %4614 = vmatprep.subr.bf16.mxu0 %v5668_v53  ;;  %4631 = vmatpush3.bf16.msra.mxu1 %v5687_v16  ;;  %v5718_v30 = vpack.c.bf16 %v1892_v52, %v1889_v27  ;;  %v5802_v52 = vrot.slane %v1638_v55, %v5396_v35 }
 0x73b   :  { %4632 = vmatprep.subr.bf16.mxu1 %v5199_v0 }
 0x73c   :  { %3840 = vmatmul.mubr.f32.gmra.mrb[20].mxu1 %v1586_v38 }
 0x73d   :  { %4616 = vmatpush1.bf16.msra.mxu0 %v5673_v41 }
 0x73e   :  { %4618 = vmatprep.subr.bf16.mxu0 %v5676_v62  ;;  %4634 = vmatpush3.bf16.msra.mxu1 %v5697_v39 }
 0x73f   :  { %4635 = vmatprep.subr.bf16.mxu1 %v5199_v0 }
 0x741   :  { %4620 = vmatpush1.bf16.msra.mxu0 %v5678_v3 }
 0x742   :  { %4622 = vmatprep.subr.bf16.mxu0 %v5682_v61  ;;  %4637 = vmatpush3.bf16.msra.mxu1 %v5703_v2 }
 0x743   :  { %4638 = vmatprep.subr.bf16.mxu1 %v5199_v0 }
 0x745   :  { %4624 = vmatpush1.bf16.msra.mxu0 %v5684_v11 }
 0x746   :  { %4626 = vmatprep.subr.bf16.mxu0 %v5691_v21  ;;  %4640 = vmatpush3.bf16.msra.mxu1 %v5706_v60 }
 0x747   :  { %4641 = vmatprep.subr.bf16.mxu1 %v5199_v0 }
 0x749   :  { %4628 = vmatpush1.bf16.msra.mxu0 %v5693_v23 }
 0x74a   :  { %4654 = vmatprep.subr.bf16.mxu0 %v5612_v29  ;;  %4643 = vmatpush3.bf16.msra.mxu1 %v5710_v8 }
 0x74b   :  { %4644 = vmatprep.subr.bf16.mxu1 %v5199_v0 }
 0x74e   :  { %4646 = vmatpush3.bf16.msra.mxu1 %v5714_v19 }
 0x74f   :  { %4647 = vmatprep.subr.bf16.mxu1 %v5199_v0 }
 0x752   :  { %4649 = vmatpush3.bf16.msra.mxu1 %v5718_v30 }
 0x753   :  { %4650 = vmatprep.subr.bf16.mxu1 %v5199_v0 }
 0x756   :  { %4652 = vmatpush3.bf16.msra.mxu1 %v5722_v46 }
 0x757   :  { %4685 = vmatprep.subr.bf16.mxu1 %v5199_v0 }
 0x807   :  { %v3803_v38 = vpop.f32.mrb[16].mxu1 }
 0x808   :  { %v1572_v45 = vadd.f32 %v3803_v38, %v5619_v42  ;;  %v1566_v48 = vpop.f32.mrb[17].mxu1 }
 0x809   :  { %v1567_v24 = vadd.f32 %v1566_v48, %v5619_v42 }
 0x80a   :  { %v1580_v58 = vmax.f32 %v1572_v45, 0.0 }
 0x80b   :  { %v1579_v1 = vmax.f32 %v1567_v24, 0.0  ;;  %v5729_v37 = vpop.f32.mrb[18].mxu1 }
 0x80c   :  { %v5731_v6 = vpop.f32.mrb[19].mxu1  ;;  %v1588_v9 = vsel %vm164_vm3, %v1580_v58, %v5655_v32 }
 0x80d   :  { %v1587_v5 = vsel %vm164_vm3, %v1579_v1, %v5601_v34  ;;  %v1900_v34 = vld [vmem:[#allocation2 + $0x840] ss:$8 sm:$0x7]  ;;  %v1823_v45 = vadd.f32 %v5731_v6, %v5802_v52 }
 0x80e   :  { %1744 = vmatmul.mubr.f32.gmra.mrb[32].mxu0 %v1587_v5  ;;  %3842 = vmatprep.mubr.f32.mxu1 %v1587_v5  ;;  %v1905_v13 = vrot.slane %v1900_v34, %v5409_v54  ;;  %v1909_v12 = vrot.slane %v1900_v34, %v5411_v57  ;;  %v5799_v57 = vrot.slane %v1900_v34, %v5396_v35 }
 0x80f   :  { %v5739_v10 = vpop.f32.mrb[20].mxu1  ;;  %3843 = vmatmul.mubr.f32.gmra.mrb[22].mxu1 %v1588_v9  ;;  %1749 = vmatprep.mubr.f32.mxu0 %v5198_v63 }
 0x810   :  { %v5742_v42 = vpop.f32.mrb[21].mxu1  ;;  %3877 = vmatprep.mubr.msk.f32.mxu1 %vm5200_vm2, %v5198_v63  ;;  %v5792_v14 = vadd.f32 %v1905_v13, %v1643_v26  ;;  %v5794_v51 = vadd.f32 %v1909_v12, %v1647_v20 }
 0x812   :  { %1750 = vmatmul.mubr.f32.gmra.mrb[34].mxu0 %v1588_v9 }
 0x813   :  { %1981 = vmatprep.mubr.f32.mxu0 %v5198_v63  ;;  %3878 = vmatmul.mubr.f32.vlgmr.msra.gmra.mrb[24].mxu1 %v5198_v63 }
 0x814   :  { %4687 = vmatpush3.bf16.msra.mxu1 %v5687_v16  ;;  %3912 = vmatprep.mubr.msk.f32.mxu1 %vm5200_vm2, %v5198_v63 }
 0x815   :  { %4688 = vmatprep.subr.bf16.mxu1 %v5199_v0 }
 0x816   :  { %1982 = vmatmul.mubr.f32.vlgmr.msra.gmra.mrb[24].mxu0 %v5198_v63 }
 0x817   :  { %4656 = vmatpush1.bf16.msra.mxu0 %v5627_v17  ;;  %2143 = vmatprep.mubr.f32.mxu0 %v5198_v63 }
 0x818   :  { %4658 = vmatprep.subr.bf16.mxu0 %v5629_v33  ;;  %4690 = vmatpush3.bf16.msra.mxu1 %v5697_v39 }
 0x819   :  { %4691 = vmatprep.subr.bf16.mxu1 %v5199_v0 }
 0x81b   :  { %4660 = vmatpush1.bf16.msra.mxu0 %v5637_v47 }
 0x81c   :  { %4662 = vmatprep.subr.bf16.mxu0 %v5640_v50  ;;  %4693 = vmatpush3.bf16.msra.mxu1 %v5703_v2 }
 0x81d   :  { %4694 = vmatprep.subr.bf16.mxu1 %v5199_v0 }
 0x81f   :  { %4664 = vmatpush1.bf16.msra.mxu0 %v5650_v22 }
 0x820   :  { %4666 = vmatprep.subr.bf16.mxu0 %v5657_v44  ;;  %4696 = vmatpush3.bf16.msra.mxu1 %v5706_v60 }
 0x821   :  { %4697 = vmatprep.subr.bf16.mxu1 %v5199_v0 }
 0x823   :  { %4668 = vmatpush1.bf16.msra.mxu0 %v5662_v43 }
 0x824   :  { %4670 = vmatprep.subr.bf16.mxu0 %v5668_v53  ;;  %4699 = vmatpush3.bf16.msra.mxu1 %v5710_v8 }
 0x825   :  { %4700 = vmatprep.subr.bf16.mxu1 %v5199_v0 }
 0x827   :  { %4672 = vmatpush1.bf16.msra.mxu0 %v5673_v41 }
 0x828   :  { %4674 = vmatprep.subr.bf16.mxu0 %v5676_v62  ;;  %4702 = vmatpush3.bf16.msra.mxu1 %v5714_v19 }
 0x829   :  { %4703 = vmatprep.subr.bf16.mxu1 %v5199_v0 }
 0x82b   :  { %4676 = vmatpush1.bf16.msra.mxu0 %v5678_v3 }
 0x82c   :  { %4678 = vmatprep.subr.bf16.mxu0 %v5682_v61  ;;  %4705 = vmatpush3.bf16.msra.mxu1 %v5718_v30 }
 0x82d   :  { %4706 = vmatprep.subr.bf16.mxu1 %v5199_v0 }
 0x82f   :  { %4680 = vmatpush1.bf16.msra.mxu0 %v5684_v11 }
 0x830   :  { %4682 = vmatprep.subr.bf16.mxu0 %v5691_v21  ;;  %4708 = vmatpush3.bf16.msra.mxu1 %v5722_v46 }
 0x831   :  { %4741 = vmatprep.subr.bf16.mxu1 %v5199_v0 }
 0x833   :  { %4684 = vmatpush1.bf16.msra.mxu0 %v5693_v23 }
 0x834   :  { %4710 = vmatprep.subr.bf16.mxu0 %v5612_v29 }
 0x8e2   :  { %v5784_v32 = vpop.f32.mrb[22].mxu1 }
 0x8e3   :  { %v5788_v49 = vpop.f32.mrb[23].mxu1 }
 0x8e6   :  { %v2054_v25 = vpop.f32.mrb[24].mxu1 }
 0x8e7   :  { %v3879_v28 = vpop.f32.mrb[25].mxu1  ;;  %v2055_v36 = vadd.f32 %v2054_v25, %v5799_v57 }
 0x8e9   :  { %v1983_v40 = vpop.f32.mrb[24].mxu0 }
 0x8ea   :  { %v4998_v56 = vadd.f32 %v5792_v14, %v1983_v40  ;;  %v1985_v59 = vpop.f32.mrb[25].mxu0 }
 0x8eb   :  { %v5000_v7 = vadd.f32 %v5794_v51, %v1985_v59 }
 0x8ec   :  { %v3168_v4 = vmul.f32 -1.442695, %v4998_v56 }
 0x8ed   :  { %v3169_v54 = vmul.f32 -1.442695, %v5000_v7 }
 0x8ee   :  { %5111 = vpow2.f32 %v3168_v4 }
 0x8ef   :  { %5113 = vpow2.f32 %v3169_v54 }
 0x8f8   :  { %v5112_v15 = vpop.eup %5111 }
 0x8f9   :  { %v2062_v18 = vadd.f32 1.0, %v5112_v15  ;;  %v5114_v27 = vpop.eup %5113  ;;  %v1828_v15 = vadd.f32 %v5729_v37, %v5802_v52 }
 0x8fa   :  { %v2069_v31 = vadd.f32 1.0, %v5114_v27 }
 0x8fb   :  { %5115 = vrcp.f32 %v2062_v18 }
 0x8fc   :  { %5117 = vrcp.f32 %v2069_v31 }
 0x905   :  { %v5116_v38 = vpop.eup %5115 }
 0x906   :  { %v2072_v48 = vmul.f32 %v5116_v38, %v2055_v36  ;;  %v5118_v58 = vpop.eup %5117 }
 0x907   :  { %v2075_v1 = vsub.f32 1.0, %v5118_v58  ;;  %v2077_v34 = vmul.f32 0.0, %v5118_v58 }
 0x908   :  { %v2073_v24 = vadd.f32 %v2072_v48, %v1823_v45 }
 0x90a   :  { %5119 = vtanh.f32 %v2073_v24 }
 0x914   :  { %v5120_v5 = vpop.eup %5119 }
 0x915   :  { %v2076_v9 = vmul.f32 %v5120_v5, %v2075_v1 }
 0x917   :  { %v5807_v26 = vadd.f32 %v2077_v34, %v2076_v9 }
 0x919   :  { %2144 = vmatmul.mubr.f32.vlgmr.msra.gmra.mrb[26].mxu0 %v5807_v26  ;;  %3913 = vmatmul.mubr.f32.vlgmr.msra.gmra.mrb[26].mxu1 %v5807_v26 }
 0x91a   :  { %4712 = vmatpush1.bf16.msra.mxu0 %v5627_v17  ;;  %4743 = vmatpush3.bf16.msra.mxu1 %v5687_v16 }
 0x91b   :  { %4714 = vmatprep.subr.bf16.mxu0 %v5629_v33  ;;  %4744 = vmatprep.subr.bf16.mxu1 %v5199_v0 }
 0x91c   :  { %2305 = vmatprep.mubr.f32.mxu0 %v5198_v63  ;;  %3947 = vmatprep.mubr.msk.f32.mxu1 %vm5200_vm2, %v5198_v63 }
 0x91e   :  { %4716 = vmatpush1.bf16.msra.mxu0 %v5637_v47  ;;  %4746 = vmatpush3.bf16.msra.mxu1 %v5697_v39 }
 0x91f   :  { %4718 = vmatprep.subr.bf16.mxu0 %v5640_v50  ;;  %4747 = vmatprep.subr.bf16.mxu1 %v5199_v0 }
 0x922   :  { %4720 = vmatpush1.bf16.msra.mxu0 %v5650_v22  ;;  %4749 = vmatpush3.bf16.msra.mxu1 %v5703_v2 }
 0x923   :  { %4722 = vmatprep.subr.bf16.mxu0 %v5657_v44  ;;  %4750 = vmatprep.subr.bf16.mxu1 %v5199_v0 }
 0x926   :  { %4724 = vmatpush1.bf16.msra.mxu0 %v5662_v43  ;;  %4752 = vmatpush3.bf16.msra.mxu1 %v5706_v60 }
 0x927   :  { %4726 = vmatprep.subr.bf16.mxu0 %v5668_v53  ;;  %4753 = vmatprep.subr.bf16.mxu1 %v5199_v0 }
 0x92a   :  { %4728 = vmatpush1.bf16.msra.mxu0 %v5673_v41  ;;  %4755 = vmatpush3.bf16.msra.mxu1 %v5710_v8 }
 0x92b   :  { %4730 = vmatprep.subr.bf16.mxu0 %v5676_v62  ;;  %4756 = vmatprep.subr.bf16.mxu1 %v5199_v0 }
 0x92e   :  { %4732 = vmatpush1.bf16.msra.mxu0 %v5678_v3  ;;  %4758 = vmatpush3.bf16.msra.mxu1 %v5714_v19 }
 0x92f   :  { %4734 = vmatprep.subr.bf16.mxu0 %v5682_v61  ;;  %4759 = vmatprep.subr.bf16.mxu1 %v5199_v0 }
 0x932   :  { %4736 = vmatpush1.bf16.msra.mxu0 %v5684_v11  ;;  %4761 = vmatpush3.bf16.msra.mxu1 %v5718_v30 }
 0x933   :  { %4738 = vmatprep.subr.bf16.mxu0 %v5691_v21  ;;  %4762 = vmatprep.subr.bf16.mxu1 %v5199_v0 }
 0x936   :  { %4740 = vmatpush1.bf16.msra.mxu0 %v5693_v23  ;;  %4764 = vmatpush3.bf16.msra.mxu1 %v5722_v46 }
 0x937   :  { %4766 = vmatprep.subr.bf16.mxu0 %v5612_v29  ;;  %4797 = vmatprep.subr.bf16.mxu1 %v5199_v0 }
 0x9ec   :  { %v2145_v35 = vpop.f32.mrb[26].mxu0  ;;  %v2216_v6 = vpop.f32.mrb[26].mxu1 }
 0x9ed   :  { %v5002_v55 = vadd.f32 %v5792_v14, %v2145_v35  ;;  %v2147_v13 = vpop.f32.mrb[27].mxu0  ;;  %v3914_v20 = vpop.f32.mrb[27].mxu1  ;;  %v2217_v7 = vadd.f32 %v2216_v6, %v5799_v57 }
 0x9ee   :  { %v5004_v25 = vadd.f32 %v5794_v51, %v2147_v13 }
 0x9ef   :  { %v3170_v12 = vmul.f32 -1.442695, %v5002_v55 }
 0x9f0   :  { %v3171_v28 = vmul.f32 -1.442695, %v5004_v25 }
 0x9f1   :  { %5121 = vpow2.f32 %v3170_v12 }
 0x9f2   :  { %5123 = vpow2.f32 %v3171_v28 }
 0x9fb   :  { %v5122_v40 = vpop.eup %5121 }
 0x9fc   :  { %v2224_v56 = vadd.f32 1.0, %v5122_v40  ;;  %v5124_v59 = vpop.eup %5123  ;;  %v1833_v40 = vadd.f32 %v5742_v42, %v5802_v52 }
 0x9fd   :  { %v2231_v4 = vadd.f32 1.0, %v5124_v59 }
 0x9fe   :  { %5125 = vrcp.f32 %v2224_v56 }
 0x9ff   :  { %5127 = vrcp.f32 %v2231_v4 }
 0xa08   :  { %v5126_v54 = vpop.eup %5125 }
 0xa09   :  { %v2234_v18 = vmul.f32 %v5126_v54, %v2217_v7  ;;  %v5128_v31 = vpop.eup %5127 }
 0xa0a   :  { %v2237_v36 = vsub.f32 1.0, %v5128_v31  ;;  %v2239_v48 = vmul.f32 %v5128_v31, %v5807_v26 }
 0xa0b   :  { %v2235_v27 = vadd.f32 %v2234_v18, %v1828_v15 }
 0xa0d   :  { %5129 = vtanh.f32 %v2235_v27 }
 0xa17   :  { %v5130_v38 = vpop.eup %5129 }
 0xa18   :  { %v2238_v45 = vmul.f32 %v5130_v38, %v2237_v36 }
 0xa1a   :  { %v5852_v24 = vadd.f32 %v2239_v48, %v2238_v45 }
 0xa1c   :  { %2306 = vmatmul.mubr.f32.vlgmr.msra.gmra.mrb[28].mxu0 %v5852_v24  ;;  %3948 = vmatmul.mubr.f32.vlgmr.msra.gmra.mrb[28].mxu1 %v5852_v24 }
 0xa1d   :  { %4768 = vmatpush1.bf16.msra.mxu0 %v5627_v17  ;;  %4799 = vmatpush3.bf16.msra.mxu1 %v5687_v16 }
 0xa1e   :  { %4770 = vmatprep.subr.bf16.mxu0 %v5629_v33  ;;  %4800 = vmatprep.subr.bf16.mxu1 %v5199_v0 }
 0xa1f   :  { %2467 = vmatprep.mubr.f32.mxu0 %v5198_v63  ;;  %3982 = vmatprep.mubr.msk.f32.mxu1 %vm5200_vm2, %v5198_v63 }
 0xa21   :  { %4772 = vmatpush1.bf16.msra.mxu0 %v5637_v47  ;;  %4802 = vmatpush3.bf16.msra.mxu1 %v5697_v39 }
 0xa22   :  { %4774 = vmatprep.subr.bf16.mxu0 %v5640_v50  ;;  %4803 = vmatprep.subr.bf16.mxu1 %v5199_v0 }
 0xa25   :  { %4776 = vmatpush1.bf16.msra.mxu0 %v5650_v22  ;;  %4805 = vmatpush3.bf16.msra.mxu1 %v5703_v2 }
 0xa26   :  { %4778 = vmatprep.subr.bf16.mxu0 %v5657_v44  ;;  %4806 = vmatprep.subr.bf16.mxu1 %v5199_v0 }
 0xa29   :  { %4780 = vmatpush1.bf16.msra.mxu0 %v5662_v43  ;;  %4808 = vmatpush3.bf16.msra.mxu1 %v5706_v60 }
 0xa2a   :  { %4782 = vmatprep.subr.bf16.mxu0 %v5668_v53  ;;  %4809 = vmatprep.subr.bf16.mxu1 %v5199_v0 }
 0xa2d   :  { %4784 = vmatpush1.bf16.msra.mxu0 %v5673_v41  ;;  %4811 = vmatpush3.bf16.msra.mxu1 %v5710_v8 }
 0xa2e   :  { %4786 = vmatprep.subr.bf16.mxu0 %v5676_v62  ;;  %4812 = vmatprep.subr.bf16.mxu1 %v5199_v0 }
 0xa31   :  { %4788 = vmatpush1.bf16.msra.mxu0 %v5678_v3  ;;  %4814 = vmatpush3.bf16.msra.mxu1 %v5714_v19 }
 0xa32   :  { %4790 = vmatprep.subr.bf16.mxu0 %v5682_v61  ;;  %4815 = vmatprep.subr.bf16.mxu1 %v5199_v0 }
 0xa35   :  { %4792 = vmatpush1.bf16.msra.mxu0 %v5684_v11  ;;  %4817 = vmatpush3.bf16.msra.mxu1 %v5718_v30 }
 0xa36   :  { %4794 = vmatprep.subr.bf16.mxu0 %v5691_v21  ;;  %4818 = vmatprep.subr.bf16.mxu1 %v5199_v0 }
 0xa39   :  { %4796 = vmatpush1.bf16.msra.mxu0 %v5693_v23  ;;  %4820 = vmatpush3.bf16.msra.mxu1 %v5722_v46 }
 0xa3a   :  { %4822 = vmatprep.subr.bf16.mxu0 %v5612_v29  ;;  %4853 = vmatprep.subr.bf16.mxu1 %v5199_v0 }
 0xaef   :  { %v2307_v37 = vpop.f32.mrb[28].mxu0  ;;  %v2378_v58 = vpop.f32.mrb[28].mxu1 }
 0xaf0   :  { %v5006_v1 = vadd.f32 %v5792_v14, %v2307_v37  ;;  %v2309_v5 = vpop.f32.mrb[29].mxu0  ;;  %v3949_v9 = vpop.f32.mrb[29].mxu1  ;;  %v2379_v25 = vadd.f32 %v2378_v58, %v5799_v57 }
 0xaf1   :  { %v5008_v35 = vadd.f32 %v5794_v51, %v2309_v5 }
 0xaf2   :  { %v3172_v34 = vmul.f32 -1.442695, %v5006_v1 }
 0xaf3   :  { %v3173_v6 = vmul.f32 -1.442695, %v5008_v35 }
 0xaf4   :  { %5131 = vpow2.f32 %v3172_v34 }
 0xaf5   :  { %5133 = vpow2.f32 %v3173_v6  ;;  %v1838_v6 = vadd.f32 %v5739_v10, %v5802_v52 }
 0xafe   :  { %v5132_v55 = vpop.eup %5131 }
 0xaff   :  { %v2386_v13 = vadd.f32 1.0, %v5132_v55  ;;  %v5134_v20 = vpop.eup %5133 }
 0xb00   :  { %v2393_v12 = vadd.f32 1.0, %v5134_v20 }
 0xb01   :  { %5135 = vrcp.f32 %v2386_v13 }
 0xb02   :  { %5137 = vrcp.f32 %v2393_v12 }
 0xb0b   :  { %v5136_v28 = vpop.eup %5135 }
 0xb0c   :  { %v2396_v56 = vmul.f32 %v5136_v28, %v2379_v25  ;;  %v5138_v4 = vpop.eup %5137 }
 0xb0d   :  { %v2399_v7 = vsub.f32 1.0, %v5138_v4  ;;  %v2401_v18 = vmul.f32 %v5138_v4, %v5852_v24 }
 0xb0e   :  { %v2397_v59 = vadd.f32 %v2396_v56, %v1833_v40 }
 0xb10   :  { %5139 = vtanh.f32 %v2397_v59 }
 0xb1a   :  { %v5140_v54 = vpop.eup %5139 }
 0xb1b   :  { %v2400_v15 = vmul.f32 %v5140_v54, %v2399_v7  ;;  %v2893_v54 = vld [vmem:[#allocation2 + $0x8b8] sm:$0xff] }
 0xb1d   :  { %v5897_v27 = vadd.f32 %v2401_v18, %v2400_v15  ;;  %v2894_v15 = vld [vmem:[#allocation2 + $0x8d0] sm:$0xff]  ;;  %v2895_v18 = vld [vmem:[#allocation2 + $0x8e8] sm:$0xff] }
 0xb1f   :  { %2468 = vmatmul.mubr.f32.vlgmr.msra.gmra.mrb[30].mxu0 %v5897_v27  ;;  %3983 = vmatmul.mubr.f32.vlgmr.msra.gmra.mrb[30].mxu1 %v5897_v27 }
 0xb20   :  { %4824 = vmatpush1.bf16.msra.mxu0 %v5627_v17  ;;  %4855 = vmatpush3.bf16.msra.mxu1 %v5687_v16 }
 0xb21   :  { %4826 = vmatprep.subr.bf16.mxu0 %v5629_v33  ;;  %4856 = vmatprep.subr.bf16.mxu1 %v5199_v0 }
 0xb22   :  { %2629 = vmatprep.mubr.f32.mxu0 %v5198_v63  ;;  %4017 = vmatprep.mubr.msk.f32.mxu1 %vm5200_vm2, %v5198_v63 }
 0xb24   :  { %4828 = vmatpush1.bf16.msra.mxu0 %v5637_v47  ;;  %4858 = vmatpush3.bf16.msra.mxu1 %v5697_v39 }
 0xb25   :  { %4830 = vmatprep.subr.bf16.mxu0 %v5640_v50  ;;  %4859 = vmatprep.subr.bf16.mxu1 %v5199_v0 }
 0xb28   :  { %4832 = vmatpush1.bf16.msra.mxu0 %v5650_v22  ;;  %4861 = vmatpush3.bf16.msra.mxu1 %v5703_v2 }
 0xb29   :  { %4834 = vmatprep.subr.bf16.mxu0 %v5657_v44  ;;  %4862 = vmatprep.subr.bf16.mxu1 %v5199_v0 }
 0xb2c   :  { %4836 = vmatpush1.bf16.msra.mxu0 %v5662_v43  ;;  %4864 = vmatpush3.bf16.msra.mxu1 %v5706_v60 }
 0xb2d   :  { %4838 = vmatprep.subr.bf16.mxu0 %v5668_v53  ;;  %4865 = vmatprep.subr.bf16.mxu1 %v5199_v0 }
 0xb30   :  { %4840 = vmatpush1.bf16.msra.mxu0 %v5673_v41  ;;  %4867 = vmatpush3.bf16.msra.mxu1 %v5710_v8 }
 0xb31   :  { %4842 = vmatprep.subr.bf16.mxu0 %v5676_v62  ;;  %4868 = vmatprep.subr.bf16.mxu1 %v5199_v0 }
 0xb34   :  { %4844 = vmatpush1.bf16.msra.mxu0 %v5678_v3  ;;  %4870 = vmatpush3.bf16.msra.mxu1 %v5714_v19 }
 0xb35   :  { %4846 = vmatprep.subr.bf16.mxu0 %v5682_v61  ;;  %4871 = vmatprep.subr.bf16.mxu1 %v5199_v0 }
 0xb38   :  { %4848 = vmatpush1.bf16.msra.mxu0 %v5684_v11  ;;  %4873 = vmatpush3.bf16.msra.mxu1 %v5718_v30 }
 0xb39   :  { %4850 = vmatprep.subr.bf16.mxu0 %v5691_v21  ;;  %4874 = vmatprep.subr.bf16.mxu1 %v5199_v0 }
 0xb3c   :  { %4852 = vmatpush1.bf16.msra.mxu0 %v5693_v23  ;;  %4876 = vmatpush3.bf16.msra.mxu1 %v5722_v46 }
 0xb3d   :  { %4878 = vmatprep.subr.bf16.mxu0 %v5612_v29  ;;  %4909 = vmatprep.subr.bf16.mxu1 %v5199_v0 }
 0xbf2   :  { %v2469_v42 = vpop.f32.mrb[30].mxu0  ;;  %v2540_v31 = vpop.f32.mrb[30].mxu1 }
 0xbf3   :  { %v5010_v36 = vadd.f32 %v5792_v14, %v2469_v42  ;;  %v2471_v38 = vpop.f32.mrb[31].mxu0  ;;  %v3984_v45 = vpop.f32.mrb[31].mxu1  ;;  %v2541_v29 = vadd.f32 %v2540_v31, %v5799_v57  ;;  %v2896_v42 = vld [vmem:[#allocation2 + $0x900] sm:$0xff] }
 0xbf4   :  { %v5012_v37 = vadd.f32 %v5794_v51, %v2471_v38  ;;  %v4945_v31 = vpack.c.bf16 %v2896_v42, %v2895_v18  ;;  %v2898_v38 = vld [vmem:[#allocation2 + $0x930] sm:$0xff] }
 0xbf5   :  { %v3174_v48 = vmul.f32 -1.442695, %v5010_v36  ;;  %v2897_v36 = vld [vmem:[#allocation2 + $0x918] sm:$0xff] }
 0xbf6   :  { %v3175_v58 = vmul.f32 -1.442695, %v5012_v37  ;;  %v4949_v45 = vpack.c.bf16 %v2898_v38, %v2897_v36  ;;  %v2900_v37 = vld [vmem:[#allocation2 + $0x960] sm:$0xff] }
 0xbf7   :  { %5141 = vpow2.f32 %v3174_v48  ;;  %v2899_v48 = vld [vmem:[#allocation2 + $0x948] sm:$0xff] }
 0xbf8   :  { %5143 = vpow2.f32 %v3175_v58  ;;  %v4953_v58 = vpack.c.bf16 %v2900_v37, %v2899_v48 }
 0xc01   :  { %v5142_v1 = vpop.eup %5141 }
 0xc02   :  { %v2548_v5 = vadd.f32 1.0, %v5142_v1  ;;  %v5144_v9 = vpop.eup %5143  ;;  %v2901_v1 = vld [vmem:[#allocation2 + $0x978] sm:$0xff] }
 0xc03   :  { %v2555_v34 = vadd.f32 1.0, %v5144_v9  ;;  %v2903_v9 = vld [vmem:[#allocation2 + $0x9a8] sm:$0xff] }
 0xc04   :  { %5145 = vrcp.f32 %v2548_v5  ;;  %v2902_v5 = vld [vmem:[#allocation2 + $0x990] sm:$0xff] }
 0xc05   :  { %5147 = vrcp.f32 %v2555_v34  ;;  %v2904_v34 = vld [vmem:[#allocation2 + $0x9c0] sm:$0xff] }
 0xc0e   :  { %v5146_v35 = vpop.eup %5145 }
 0xc0f   :  { %v2558_v55 = vmul.f32 %v5146_v35, %v2541_v29  ;;  %v5148_v20 = vpop.eup %5147  ;;  %v4961_v29 = vpack.c.bf16 %v2904_v34, %v2903_v9  ;;  %v3007_v35 = vld [vmem:[#allocation2 + $0x9f0] sm:$0xff] }
 0xc10   :  { %v2561_v12 = vsub.f32 1.0, %v5148_v20  ;;  %v2563_v40 = vmul.f32 %v5148_v20, %v5897_v27  ;;  %v3010_v20 = vld [vmem:[#allocation2 + $0xa38] sm:$0xff] }
 0xc11   :  { %v2559_v13 = vadd.f32 %v2558_v55, %v1838_v6  ;;  %v3008_v6 = vld [vmem:[#allocation2 + $0xa08] sm:$0xff] }
 0xc12   :  { %v4965_v55 = vpack.c.bf16 %v3008_v6, %v3007_v35 }
 0xc13   :  { %5149 = vtanh.f32 %v2559_v13  ;;  %v3009_v13 = vld [vmem:[#allocation2 + $0xa20] sm:$0xff] }
 0xc1d   :  { %v5150_v25 = vpop.eup %5149 }
 0xc1e   :  { %v2562_v28 = vmul.f32 %v5150_v25, %v2561_v12  ;;  %v4969_v12 = vpack.c.bf16 %v3010_v20, %v3009_v13 }
 0xc20   :  { %v5942_v56 = vadd.f32 %v2563_v40, %v2562_v28 }
 0xc22   :  { %2630 = vmatmul.mubr.f32.vlgmr.msra.gmra.mrb[32].mxu0 %v5942_v56  ;;  %4018 = vmatmul.mubr.f32.vlgmr.msra.gmra.mrb[32].mxu1 %v5942_v56 }
 0xc23   :  { %4880 = vmatpush1.bf16.msra.mxu0 %v5627_v17  ;;  %4911 = vmatpush3.bf16.msra.mxu1 %v5687_v16  ;;  %v2890_v17 = vld [vmem:[#allocation2 + $0x870] sm:$0xff] }
 0xc24   :  { %4882 = vmatprep.subr.bf16.mxu0 %v5629_v33  ;;  %4912 = vmatprep.subr.bf16.mxu1 %v5199_v0 }
 0xc25   :  { %2791 = vmatprep.mubr.f32.mxu0 %v5198_v63  ;;  %4052 = vmatprep.mubr.msk.f32.mxu1 %vm5200_vm2, %v5198_v63  ;;  %v2889_v63 = vld [vmem:[#allocation2 + $0x858] sm:$0xff] }
 0xc26   :  { %v4933_v33 = vpack.c.bf16 %v2890_v17, %v2889_v63 }
 0xc27   :  { %4884 = vmatpush1.bf16.msra.mxu0 %v5637_v47  ;;  %4914 = vmatpush3.bf16.msra.mxu1 %v5697_v39 }
 0xc28   :  { %4886 = vmatprep.subr.bf16.mxu0 %v5640_v50  ;;  %4915 = vmatprep.subr.bf16.mxu1 %v5199_v0 }
 0xc2b   :  { %4888 = vmatpush1.bf16.msra.mxu0 %v5650_v22  ;;  %4917 = vmatpush3.bf16.msra.mxu1 %v5703_v2 }
 0xc2c   :  { %4890 = vmatprep.subr.bf16.mxu0 %v5657_v44  ;;  %4918 = vmatprep.subr.bf16.mxu1 %v5199_v0 }
 0xc2f   :  { %4892 = vmatpush1.bf16.msra.mxu0 %v5662_v43  ;;  %4920 = vmatpush3.bf16.msra.mxu1 %v5706_v60 }
 0xc30   :  { %4894 = vmatprep.subr.bf16.mxu0 %v5668_v53  ;;  %4921 = vmatprep.subr.bf16.mxu1 %v5199_v0 }
 0xc33   :  { %4896 = vmatpush1.bf16.msra.mxu0 %v5673_v41  ;;  %4923 = vmatpush3.bf16.msra.mxu1 %v5710_v8 }
 0xc34   :  { %4898 = vmatprep.subr.bf16.mxu0 %v5676_v62  ;;  %4924 = vmatprep.subr.bf16.mxu1 %v5199_v0 }
 0xc37   :  { %4900 = vmatpush1.bf16.msra.mxu0 %v5678_v3  ;;  %4926 = vmatpush3.bf16.msra.mxu1 %v5714_v19 }
 0xc38   :  { %4902 = vmatprep.subr.bf16.mxu0 %v5682_v61  ;;  %4927 = vmatprep.subr.bf16.mxu1 %v5199_v0 }
 0xc3b   :  { %4904 = vmatpush1.bf16.msra.mxu0 %v5684_v11  ;;  %4929 = vmatpush3.bf16.msra.mxu1 %v5718_v30  ;;  %v2891_v30 = vld [vmem:[#allocation2 + $0x888] sm:$0xff] }
 0xc3c   :  { %4906 = vmatprep.subr.bf16.mxu0 %v5691_v21  ;;  %4930 = vmatprep.subr.bf16.mxu1 %v5199_v0 }
 0xc3f   :  { %4908 = vmatpush1.bf16.msra.mxu0 %v5693_v23  ;;  %4932 = vmatpush3.bf16.msra.mxu1 %v5722_v46  ;;  %v1843_v23 = vadd.f32 %v5788_v49, %v5802_v52  ;;  %v2892_v46 = vld [vmem:[#allocation2 + $0x8a0] sm:$0xff]  ;;  %v4941_v49 = vpack.c.bf16 %v2894_v15, %v2893_v54 }
 0xc40   :  { %4934 = vmatprep.subr.bf16.mxu0 %v4933_v33  ;;  %v4937_v7 = vpack.c.bf16 %v2892_v46, %v2891_v30  ;;  %4966 = vmatprep.subr.bf16.mxu1 %v4965_v55 }
 0xcf5   :  { %v2631_v47 = vpop.f32.mrb[32].mxu0  ;;  %v2702_v50 = vpop.f32.mrb[32].mxu1 }
 0xcf6   :  { %v5014_v22 = vadd.f32 %v5792_v14, %v2631_v47  ;;  %v2633_v44 = vpop.f32.mrb[33].mxu0  ;;  %v4019_v43 = vpop.f32.mrb[33].mxu1  ;;  %v2703_v16 = vadd.f32 %v2702_v50, %v5799_v57 }
 0xcf7   :  { %v5016_v41 = vadd.f32 %v5794_v51, %v2633_v44 }
 0xcf8   :  { %v3176_v53 = vmul.f32 -1.442695, %v5014_v22 }
 0xcf9   :  { %v3177_v62 = vmul.f32 -1.442695, %v5016_v41  ;;  %v2905_v41 = vld [vmem:[#allocation2 + $0x9d8] ss:$0 sm:$0xff] }
 0xcfa   :  { %5151 = vpow2.f32 %v3176_v53  ;;  %v1848_v53 = vadd.f32 %v5784_v32, %v5802_v52 }
 0xcfb   :  { %5153 = vpow2.f32 %v3177_v62 }
 0xd04   :  { %v5152_v0 = vpop.eup %5151 }
 0xd05   :  { %v2710_v3 = vadd.f32 1.0, %v5152_v0  ;;  %v5154_v61 = vpop.eup %5153 }
 0xd06   :  { %v2717_v11 = vadd.f32 1.0, %v5154_v61 }
 0xd07   :  { %5155 = vrcp.f32 %v2710_v3 }
 0xd08   :  { %5157 = vrcp.f32 %v2717_v11 }
 0xd11   :  { %v5156_v21 = vpop.eup %5155 }
 0xd12   :  { %v2720_v39 = vmul.f32 %v5156_v21, %v2703_v16  ;;  %v5158_v60 = vpop.eup %5157 }
 0xd13   :  { %v2723_v8 = vsub.f32 1.0, %v5158_v60  ;;  %v2725_v59 = vmul.f32 %v5158_v60, %v5942_v56 }
 0xd14   :  { %v2721_v2 = vadd.f32 %v2720_v39, %v1843_v23 }
 0xd16   :  { %5159 = vtanh.f32 %v2721_v2 }
 0xd20   :  { %v5160_v19 = vpop.eup %5159 }
 0xd21   :  { %v2724_v10 = vmul.f32 %v5160_v19, %v2723_v8 }
 0xd23   :  { %v5985_v4 = vadd.f32 %v2725_v59, %v2724_v10  ;;  %v3011_v10 = vld [vmem:[#allocation2 + $0xa50] ss:$0 sm:$0xff] }
 0xd25   :  { %2792 = vmatmul.mubr.f32.vlgmr.msra.gmra.mrb[34].mxu0 %v5985_v4  ;;  %4053 = vmatmul.mubr.f32.vlgmr.msra.gmra.mrb[34].mxu1 %v5985_v4 }
 0xd26   :  { %4936 = vmatpush3.bf16.msra.mxu0 %v4933_v33  ;;  %4087 = vmatprep.mubr.f32.mxu0 %v5807_v26  ;;  %v4957_v26 = vpack.c.bf16 %v2902_v5, %v2901_v1 }
 0xd27   :  { %4938 = vmatprep.subr.bf16.mxu0 %v4937_v7  ;;  %4968 = vmatpush3.bf16.msra.mxu1 %v4965_v55 }
 0xd28   :  { %4970 = vmatprep.subr.bf16.mxu1 %v4969_v12 }
 0xd2a   :  { %4940 = vmatpush3.bf16.msra.mxu0 %v4937_v7 }
 0xd2b   :  { %4942 = vmatprep.subr.bf16.mxu0 %v4941_v49  ;;  %4972 = vmatpush3.bf16.msra.mxu1 %v4969_v12 }
 0xd2e   :  { %4944 = vmatpush3.bf16.msra.mxu0 %v4941_v49 }
 0xd2f   :  { %4946 = vmatprep.subr.bf16.mxu0 %v4945_v31 }
 0xd32   :  { %4948 = vmatpush3.bf16.msra.mxu0 %v4945_v31 }
 0xd33   :  { %4950 = vmatprep.subr.bf16.mxu0 %v4949_v45 }
 0xd36   :  { %4952 = vmatpush3.bf16.msra.mxu0 %v4949_v45 }
 0xd37   :  { %4954 = vmatprep.subr.bf16.mxu0 %v4953_v58 }
 0xd3a   :  { %4956 = vmatpush3.bf16.msra.mxu0 %v4953_v58 }
 0xd3b   :  { %4958 = vmatprep.subr.bf16.mxu0 %v4957_v26 }
 0xd3e   :  { %4960 = vmatpush3.bf16.msra.mxu0 %v4957_v26 }
 0xd3f   :  { %4962 = vmatprep.subr.bf16.mxu0 %v4961_v29 }
 0xd42   :  { %4964 = vmatpush3.bf16.msra.mxu0 %v4961_v29 }
 0xd45   :  { %4088 = vmatmul.mubr.f32.vlgmr.msra.gmra.mrb[36].mxu0 %v5852_v24 }
 0xd46   :  { %4090 = vmatprep.mubr.f32.mxu0 %v5897_v27 }
 0xd49   :  { %4091 = vmatmul.mubr.f32.gmra.mrb[38].mxu0 %v5942_v56 }
 0xd4a   :  { %4093 = vmatprep.mubr.f32.mxu0 %v5985_v4 }
 0xdf8   :  { %v2793_v25 = vpop.f32.mrb[34].mxu0  ;;  %v2864_v28 = vpop.f32.mrb[34].mxu1 }
 0xdf9   :  { %v5018_v24 = vadd.f32 %v5792_v14, %v2793_v25  ;;  %v2795_v40 = vpop.f32.mrb[35].mxu0  ;;  %v4054_v27 = vpop.f32.mrb[35].mxu1  ;;  %v2865_v44 = vadd.f32 %v2864_v28, %v5799_v57 }
 0xdfa   :  { %v5020_v56 = vadd.f32 %v5794_v51, %v2795_v40 }
 0xdfb   :  { %v3178_v63 = vmul.f32 -1.442695, %v5018_v24 }
 0xdfc   :  { %v3179_v17 = vmul.f32 -1.442695, %v5020_v56 }
 0xdfd   :  { %5161 = vpow2.f32 %v3178_v63 }
 0xdfe   :  { %5163 = vpow2.f32 %v3179_v17 }
 0xe07   :  { %v5162_v33 = vpop.eup %5161 }
 0xe08   :  { %v2872_v47 = vadd.f32 1.0, %v5162_v33  ;;  %v5164_v50 = vpop.eup %5163 }
 0xe09   :  { %v2879_v22 = vadd.f32 1.0, %v5164_v50 }
 0xe0a   :  { %5165 = vrcp.f32 %v2872_v47 }
 0xe0b   :  { %5167 = vrcp.f32 %v2879_v22 }
 0xe14   :  { %v5166_v43 = vpop.eup %5165 }
 0xe15   :  { %v2882_v14 = vmul.f32 %v5166_v43, %v2865_v44  ;;  %v5168_v2 = vpop.eup %5167 }
 0xe16   :  { %v2885_v60 = vsub.f32 1.0, %v5168_v2  ;;  %v2887_v30 = vmul.f32 %v5168_v2, %v5985_v4 }
 0xe17   :  { %v2883_v62 = vadd.f32 %v2882_v14, %v1848_v53 }
 0xe18   :  { %v4089_v0 = vpop.f32.mrb[36].mxu0 }
 0xe19   :  { %5169 = vtanh.f32 %v2883_v62  ;;  %v2978_v51 = vadd.f32 %v4089_v0, %v2905_v41  ;;  %v2972_v3 = vpop.f32.mrb[37].mxu0 }
 0xe1a   :  { %v2973_v61 = vadd.f32 %v2972_v3, %v2905_v41 }
 0xe1b   :  { %v3002_v21 = vmax.f32 %v2978_v51, 0.0 }
 0xe1c   :  { %v3001_v11 = vmax.f32 %v2973_v61, 0.0  ;;  %v4092_v16 = vpop.f32.mrb[38].mxu0 }
 0xe1d   :  { %v2988_v23 = vadd.f32 %v4092_v16, %v2905_v41  ;;  %v2982_v39 = vpop.f32.mrb[39].mxu0 }
 0xe1e   :  { %v2983_v57 = vadd.f32 %v2982_v39, %v2905_v41  ;;  %4104 = vmatprep.mubr.msk.f32.mxu1 %vm3012_vm4, %v3001_v11 }
 0xe1f   :  { %4105 = vmatmul.mubr.msk.f32.vlgmr.msra.gmra.mrb[36].mxu1 %vm3012_vm4, %v3002_v21  ;;  %v3004_v52 = vmax.f32 %v2988_v23, 0.0 }
 0xe20   :  { %v3003_v32 = vmax.f32 %v2983_v57, 0.0 }
 0xe22   :  { %4107 = vmatprep.mubr.msk.f32.mxu1 %vm3012_vm4, %v3003_v32 }
 0xe23   :  { %v5170_v8 = vpop.eup %5169  ;;  %4108 = vmatmul.mubr.msk.f32.gmra.mrb[38].mxu1 %vm3012_vm4, %v3004_v52 }
 0xe24   :  { %v2886_v19 = vmul.f32 %v5170_v8, %v2885_v60 }
 0xe26   :  { %v2888_v46 = vadd.f32 %v2887_v30, %v2886_v19 }
 0xe28   :  { %4094 = vmatmul.mubr.f32.gmra.mrb[40].mxu0 %v2888_v46 }
 0xef2   :  { %v4106_v59 = vpop.f32.mrb[36].mxu1 }
 0xef3   :  { %v3103_v7 = vadd.f32 %v4106_v59, %v3011_v10  ;;  %v3097_v54 = vpop.f32.mrb[37].mxu1 }
 0xef4   :  { %v3098_v15 = vadd.f32 %v3097_v54, %v3011_v10 }
 0xef5   :  { %3128 = vst.msk [vmem:[%s6032_s2 + $0x8] sm:$0xff] %vm3126_vm5, %v3103_v7 }
 0xef6   :  { %3127 = vst.msk [vmem:[%s6032_s2] sm:$0xff] %vm3126_vm5, %v3098_v15  ;;  %v4109_v49 = vpop.f32.mrb[38].mxu1 }
 0xef7   :  { %v3113_v4 = vadd.f32 %v4109_v49, %v3011_v10  ;;  %v3107_v18 = vpop.f32.mrb[39].mxu1 }
 0xef8   :  { %v3108_v42 = vadd.f32 %v3107_v18, %v3011_v10 }
 0xef9   :  { %3130 = vst.msk [vmem:[%s6032_s2 + $0x18] sm:$0xff] %vm3126_vm5, %v3113_v4 }
 0xefa   :  { %3129 = vst.msk [vmem:[%s6032_s2 + $0x10] sm:$0xff] %vm3126_vm5, %v3108_v42 }
 0xefb   :  { %v4095_v31 = vpop.f32.mrb[40].mxu0 }
 0xefc   :  { %v2998_v36 = vadd.f32 %v4095_v31, %v2905_v41  ;;  %v2992_v38 = vpop.f32.mrb[41].mxu0 }
 0xefd   :  { %v2993_v45 = vadd.f32 %v2992_v38, %v2905_v41 }
 0xefe   :  { %v3006_v37 = vmax.f32 %v2998_v36, 0.0 }
 0xeff   :  { %v3005_v48 = vmax.f32 %v2993_v45, 0.0 }
 0xf01   :  { %4110 = vmatprep.mubr.msk.f32.mxu1 %vm3012_vm4, %v3005_v48 }
 0xf02   :  { %4111 = vmatmul.mubr.msk.f32.gmra.mrb[40].mxu1 %vm3012_vm4, %v3006_v37 }
 0xfd5   :  { %v4112_v58 = vpop.f32.mrb[40].mxu1 }
 0xfd6   :  { %v3123_v1 = vadd.f32 %v4112_v58, %v3011_v10  ;;  %v3117_v5 = vpop.f32.mrb[41].mxu1 }
 0xfd7   :  { %v3118_v26 = vadd.f32 %v3117_v5, %v3011_v10 }
 0xfd8   :  { %3132 = vst.msk [vmem:[%s6032_s2 + $0x28] sm:$0xff] %vm3126_vm5, %v3123_v1 }
 0xfd9   :  { %3131 = vst.msk [vmem:[%s6032_s2 + $0x20] sm:$0xff] %vm3126_vm5, %v3118_v26 }
 0xfda   :  { %3137 = vsyncpa [#allocation3], 1 }

</bundles_post_ra>
